<compile_context>
chip_gen: v7x
topology: tpu7x:2x2x1
jax: 0.10.0
libtpu: 0.0.40
codegen_flags: <defaults>
</compile_context>

<pallas_src>
import math
import jax
import jax.numpy as jnp
from jax import lax
from jax.experimental import pallas as pl
from jax.experimental.pallas import tpu as pltpu


# ----------------------------- helpers -----------------------------

_UNSET = object()
_VMEM_LIMIT = _UNSET


def _vmem_limit_bytes():
    """Chip-aware scoped-VMEM budget (safe fallback to compiler default)."""
    global _VMEM_LIMIT
    if _VMEM_LIMIT is _UNSET:
        try:
            cap = pltpu.get_tpu_info().vmem_capacity_bytes
            # leave headroom for double-buffering; cap keeps v7x (64 MiB/TC) safe
            _VMEM_LIMIT = min(int(cap) * 3 // 4, 48 * 1024 * 1024)
        except Exception:  # noqa: BLE001 - any failure -> use compiler default
            _VMEM_LIMIT = None
    return _VMEM_LIMIT


def _compiler_params(dimension_semantics):
    kwargs = dict(dimension_semantics=dimension_semantics)
    limit = _vmem_limit_bytes()
    if limit is not None:
        kwargs["vmem_limit_bytes"] = limit
    return pltpu.CompilerParams(**kwargs)


def _pick_tile(dim, target, align):
    """Largest tile <= target that is a multiple of `align` and divides `dim`;
    falls back to the full dim (always a legal block shape)."""
    if dim <= target:
        return dim
    t = (target // align) * align
    while t >= align:
        if dim % t == 0:
            return t
        t -= align
    return dim


# ----------------------------- Pallas kernels -----------------------------


def fused_matmul(x, w, *, bias=None, gamma=None, beta=None, residual=None,
                 relu=False, rhs_transposed=False, out_dtype=None,
                 eps=1e-5, tm_target=256, tn_target=256):
    """out = [relu](LN?(x) @ W (+ bias)) (+ residual).

    x: (M, K).  w: (K, N), or (N, K) if rhs_transposed (contraction on K done
    inside the kernel — no host-side transpose).  LN (gamma/beta over K) is
    fused before the dot.  bf16 MXU operands, f32 accumulation.
    """
    M, K = x.shape
    N = w.shape[0] if rhs_transposed else w.shape[1]
    out_dtype = out_dtype or x.dtype
    tm = _pick_tile(M, tm_target, 8)
    tn = _pick_tile(N, tn_target, 128)
    grid = (M // tm, N // tn)

    has_ln = gamma is not None
    has_bias = bias is not None
    has_res = residual is not None

    def kernel(*refs):
        it = iter(refs)
        x_ref = next(it)
        w_ref = next(it)
        g_ref = next(it) if has_ln else None
        bt_ref = next(it) if has_ln else None
        bias_ref = next(it) if has_bias else None
        res_ref = next(it) if has_res else None
        o_ref = next(it)

        lhs = x_ref[...].astype(jnp.float32)
        if has_ln:  # LayerNorm math stays in f32 (v5e has no bf16 VPU/EUP)
            mu = jnp.mean(lhs, axis=-1, keepdims=True)
            var = jnp.mean(jnp.square(lhs - mu), axis=-1, keepdims=True)
            lhs = (lhs - mu) * lax.rsqrt(var + eps) * g_ref[...] + bt_ref[...]

        lhs_bf = lhs.astype(jnp.bfloat16)
        rhs_bf = w_ref[...].astype(jnp.bfloat16)
        if rhs_transposed:
            acc = lax.dot_general(lhs_bf, rhs_bf, (((1,), (1,)), ((), ())),
                                  preferred_element_type=jnp.float32)
        else:
            acc = jnp.dot(lhs_bf, rhs_bf, preferred_element_type=jnp.float32)

        if has_bias:
            acc = acc + bias_ref[...]
        if relu:
            acc = jnp.maximum(acc, 0.0)
        if has_res:
            acc = acc + res_ref[...].astype(jnp.float32)
        o_ref[...] = acc.astype(o_ref.dtype)

    in_specs = [pl.BlockSpec((tm, K), lambda i, j: (i, 0))]
    if rhs_transposed:
        in_specs.append(pl.BlockSpec((tn, K), lambda i, j: (j, 0)))
    else:
        in_specs.append(pl.BlockSpec((K, tn), lambda i, j: (0, j)))
    args = [x, w]
    if has_ln:
        in_specs += [pl.BlockSpec((1, K), lambda i, j: (0, 0))] * 2
        args += [gamma, beta]
    if has_bias:
        in_specs.append(pl.BlockSpec((1, tn), lambda i, j: (0, j)))
        args.append(bias)
    if has_res:
        in_specs.append(pl.BlockSpec((tm, tn), lambda i, j: (i, j)))
        args.append(residual)

    return pl.pallas_call(
        kernel,
        grid=grid,
        in_specs=in_specs,
        out_specs=pl.BlockSpec((tm, tn), lambda i, j: (i, j)),
        out_shape=jax.ShapeDtypeStruct((M, N), out_dtype),
        compiler_params=_compiler_params(("parallel", "parallel")),
    )(*args)


def fused_ln_qkv(x, gamma, beta, wqkv, eps=1e-5, tm_target=256):
    """q, k, v = split(LN(x) @ Wqkv).  x: (M, C), wqkv: (C, 3C). Outputs bf16."""
    M, C = x.shape
    threeC = wqkv.shape[1]
    tm = _pick_tile(M, tm_target, 8)
    grid = (M // tm,)

    def kernel(x_ref, g_ref, bt_ref, w_ref, q_ref, k_ref, v_ref):
        xf = x_ref[...].astype(jnp.float32)
        mu = jnp.mean(xf, axis=-1, keepdims=True)
        var = jnp.mean(jnp.square(xf - mu), axis=-1, keepdims=True)
        xn = (xf - mu) * lax.rsqrt(var + eps) * g_ref[...] + bt_ref[...]
        acc = jnp.dot(xn.astype(jnp.bfloat16), w_ref[...],
                      preferred_element_type=jnp.float32)
        q_ref[...] = acc[:, :C].astype(q_ref.dtype)
        k_ref[...] = acc[:, C:2 * C].astype(k_ref.dtype)
        v_ref[...] = acc[:, 2 * C:].astype(v_ref.dtype)

    row_spec = pl.BlockSpec((tm, C), lambda i: (i, 0))
    vec_spec = pl.BlockSpec((1, C), lambda i: (0, 0))
    return pl.pallas_call(
        kernel,
        grid=grid,
        in_specs=[row_spec, vec_spec, vec_spec,
                  pl.BlockSpec((C, threeC), lambda i: (0, 0))],
        out_specs=[row_spec, row_spec, row_spec],
        out_shape=[jax.ShapeDtypeStruct((M, C), jnp.bfloat16)] * 3,
        compiler_params=_compiler_params(("parallel",)),
    )(x, gamma, beta, wqkv)


def fused_ln_mlp_residual(x, gamma, beta, w1, b1, w2, b2, eps=1e-5, tm_target=256):
    """out = x + relu(LN(x) @ W1 + b1) @ W2 + b2, row-tiled so the (tm, 4C)
    hidden never leaves VMEM."""
    M, C = x.shape
    H = w1.shape[1]
    tm = _pick_tile(M, tm_target, 8)
    grid = (M // tm,)

    def kernel(x_ref, g_ref, bt_ref, w1_ref, b1_ref, w2_ref, b2_ref, o_ref):
        xf = x_ref[...].astype(jnp.float32)
        mu = jnp.mean(xf, axis=-1, keepdims=True)
        var = jnp.mean(jnp.square(xf - mu), axis=-1, keepdims=True)
        xn = (xf - mu) * lax.rsqrt(var + eps) * g_ref[...] + bt_ref[...]
        h = jnp.dot(xn.astype(jnp.bfloat16), w1_ref[...],
                    preferred_element_type=jnp.float32) + b1_ref[...]
        h = jnp.maximum(h, 0.0).astype(jnp.bfloat16)
        out = jnp.dot(h, w2_ref[...], preferred_element_type=jnp.float32) + b2_ref[...]
        o_ref[...] = (xf + out).astype(o_ref.dtype)

    return pl.pallas_call(
        kernel,
        grid=grid,
        in_specs=[
            pl.BlockSpec((tm, C), lambda i: (i, 0)),
            pl.BlockSpec((1, C), lambda i: (0, 0)),
            pl.BlockSpec((1, C), lambda i: (0, 0)),
            pl.BlockSpec((C, H), lambda i: (0, 0)),
            pl.BlockSpec((1, H), lambda i: (0, 0)),
            pl.BlockSpec((H, C), lambda i: (0, 0)),
            pl.BlockSpec((1, C), lambda i: (0, 0)),
        ],
        out_specs=pl.BlockSpec((tm, C), lambda i: (i, 0)),
        out_shape=jax.ShapeDtypeStruct((M, C), jnp.float32),
        compiler_params=_compiler_params(("parallel",)),
    )(x, gamma, beta, w1, b1, w2, b2)


def flash_attention(q, k, v, n_head):
    """Causal multi-head attention, flash-style online softmax.

    q, k, v: (B, T, C) with heads contiguous along C (no host-side head
    transpose).  Grid (B, q_tiles, kv_tiles); kv is the streamed reduction
    axis; kv tiles entirely above the diagonal skip compute.
    """
    B, T, C = q.shape
    D = C // n_head
    scale = 1.0 / math.sqrt(D)
    tq = _pick_tile(T, 128, 8)
    tkv = _pick_tile(T, 128, 8)
    nq, nkv = T // tq, T // tkv
    NEG = -1e30  # finite mask value: avoids exp(-inf - -inf) = NaN on masked rows

    def kernel(q_ref, k_ref, v_ref, o_ref, m_s, l_s, acc_s):
        qi = pl.program_id(1)
        kvi = pl.program_id(2)
        q_start = qi * tq
        kv_start = kvi * tkv

        @pl.when(kvi == 0)
        def _():
            m_s[...] = jnp.full_like(m_s, NEG)
            l_s[...] = jnp.zeros_like(l_s)
            acc_s[...] = jnp.zeros_like(acc_s)

        # skip kv tiles that lie entirely above the causal diagonal
        @pl.when(kv_start <= q_start + (tq - 1))
        def _():
            row = q_start + lax.broadcasted_iota(jnp.int32, (tq, tkv), 0)
            col = kv_start + lax.broadcasted_iota(jnp.int32, (tq, tkv), 1)
            causal = row >= col
            for h in range(n_head):  # heads are contiguous lane slices of C
                lo, hi = h * D, (h + 1) * D
                qh = q_ref[0, :, lo:hi]                      # (tq, D) bf16
                kh = k_ref[0, :, lo:hi]                      # (tkv, D) bf16
                vh = v_ref[0, :, lo:hi]                      # (tkv, D) bf16
                s = lax.dot_general(qh, kh, (((1,), (1,)), ((), ())),
                                    preferred_element_type=jnp.float32) * scale
                s = jnp.where(causal, s, NEG)
                m_prev = m_s[h]                              # (tq, 1)
                m_new = jnp.maximum(m_prev, jnp.max(s, axis=-1, keepdims=True))
                alpha = jnp.exp(m_prev - m_new)
                p = jnp.exp(s - m_new)
                l_s[h] = alpha * l_s[h] + jnp.sum(p, axis=-1, keepdims=True)
                acc_s[h] = alpha * acc_s[h] + jnp.dot(
                    p.astype(jnp.bfloat16), vh, preferred_element_type=jnp.float32)
                m_s[h] = m_new

        @pl.when(kvi == pl.num_programs(2) - 1)
        def _():
            for h in range(n_head):
                lo, hi = h * D, (h + 1) * D
                o_ref[0, :, lo:hi] = (
                    acc_s[h] * pl.reciprocal(l_s[h], approx=True)
                ).astype(o_ref.dtype)

    q_spec = pl.BlockSpec((1, tq, C), lambda b, qi, ki: (b, qi, 0))
    kv_spec = pl.BlockSpec((1, tkv, C), lambda b, qi, ki: (b, ki, 0))
    return pl.pallas_call(
        kernel,
        grid=(B, nq, nkv),
        in_specs=[q_spec, kv_spec, kv_spec],
        out_specs=q_spec,
        out_shape=jax.ShapeDtypeStruct((B, T, C), jnp.bfloat16),
        scratch_shapes=[
            pltpu.VMEM((n_head, tq, 1), jnp.float32),   # running max
            pltpu.VMEM((n_head, tq, 1), jnp.float32),   # running sum
            pltpu.VMEM((n_head, tq, D), jnp.float32),   # output accumulator
        ],
        compiler_params=_compiler_params(("parallel", "parallel", "arbitrary")),
    )(q, k, v)


# ----------------------------- Model glue (plain JAX) -----------------------------


def init_params(key, vocab_size, block_size, n_embd, n_layer, n_head):
    std = 0.02
    keys = jax.random.split(key, 2 + 4 * n_layer)
    ki = iter(keys)

    def normal(shape):  # weights stored bf16 (MXU operands); f32 init numerics
        return (jax.random.normal(next(ki), shape, jnp.float32) * std).astype(jnp.bfloat16)

    params = {
        # lm_head.weight (vocab, n_embd); tied with the token embedding table.
        "wte": normal((vocab_size, n_embd)),
        "wpe": normal((block_size, n_embd)),
        "lnf_g": jnp.ones((1, n_embd), jnp.float32),
        "lnf_b": jnp.zeros((1, n_embd), jnp.float32),
        "blocks": [],
    }
    for _ in range(n_layer):
        blk = {
            "ln1_g": jnp.ones((1, n_embd), jnp.float32),
            "ln1_b": jnp.zeros((1, n_embd), jnp.float32),
            # fused q|k|v projection (no bias, as in tinygpt heads)
            "wqkv": normal((n_embd, 3 * n_embd)),
            "wo": normal((n_embd, n_embd)),
            "bo": jnp.zeros((1, n_embd), jnp.float32),
            "ln2_g": jnp.ones((1, n_embd), jnp.float32),
            "ln2_b": jnp.zeros((1, n_embd), jnp.float32),
            "w1": normal((n_embd, 4 * n_embd)),
            "b1": jnp.zeros((1, 4 * n_embd), jnp.float32),
            "w2": normal((4 * n_embd, n_embd)),
            "b2": jnp.zeros((1, n_embd), jnp.float32),
        }
        params["blocks"].append(blk)
    return params


def gpt_forward(params, idx, n_head):
    B, T = idx.shape
    C = params["wte"].shape[1]
    vocab = params["wte"].shape[0]

    # Embedding gathers stay in plain JAX (gather has no clean simple Pallas win).
    tok_emb = jnp.take(params["wte"], idx, axis=0).astype(jnp.float32)   # (B, T, C)
    pos_emb = params["wpe"][:T].astype(jnp.float32)                       # (T, C)
    x = (tok_emb + pos_emb[None, :, :]).reshape(B * T, C)                 # f32 residual stream

    for blk in params["blocks"]:
        # --- attention sub-block: LN1 fused into the single qkv projection ---
        q, k, v = fused_ln_qkv(x, blk["ln1_g"], blk["ln1_b"], blk["wqkv"])
        q = q.reshape(B, T, C)      # free reshapes; heads stay contiguous in C
        k = k.reshape(B, T, C)
        v = v.reshape(B, T, C)
        attn = flash_attention(q, k, v, n_head).reshape(B * T, C)
        # output projection with bias + residual fused into the epilogue
        x = fused_matmul(attn, blk["wo"], bias=blk["bo"], residual=x,
                         out_dtype=jnp.float32)

        # --- feed-forward sub-block: LN2 + MLP + residual fused ---
        x = fused_ln_mlp_residual(x, blk["ln2_g"], blk["ln2_b"],
                                  blk["w1"], blk["b1"], blk["w2"], blk["b2"])

    # final LN fused into the lm_head matmul; tied (vocab, C) weight is
    # contracted on C inside the kernel (no wte.T materialisation).
    logits = fused_matmul(x, params["wte"],
                          gamma=params["lnf_g"], beta=params["lnf_b"],
                          rhs_transposed=True, out_dtype=jnp.float32)
    return logits.reshape(B, T, vocab)
    # TODO(synk): targets/cross-entropy path and autoregressive generate() are
    # host-side control flow and are intentionally not implemented as kernels.


if __name__ == "__main__":
    # Small GPTConfig-consistent shapes
    vocab_size = 64
    block_size = 16
    n_embd = 32
    n_layer = 2
    n_head = 4
    B, T = 2, 8

    key = jax.random.PRNGKey(0)
    pkey, ikey = jax.random.split(key)
    params = init_params(pkey, vocab_size, block_size, n_embd, n_layer, n_head)
    idx = jax.random.randint(ikey, (B, T), 0, vocab_size, dtype=jnp.int32)

    fwd = jax.jit(gpt_forward, static_argnames=("n_head",))
    logits = fwd(params, idx, n_head=n_head)
    logits = jax.block_until_ready(logits)
    assert logits.shape == (B, T, vocab_size)
    assert bool(jnp.all(jnp.isfinite(logits)))
    print("KERNEL_OK")
</pallas_src>

<mosaic_0001>
module attributes {stable_mosaic.version = 11 : i64} {
  func.func @kernel(%arg0: i32, %arg1: memref<16x32xf32, #tpu.memory_space<vmem>>, %arg2: memref<1x32xf32, #tpu.memory_space<vmem>>, %arg3: memref<1x32xf32, #tpu.memory_space<vmem>>, %arg4: memref<32x96xbf16, #tpu.memory_space<vmem>>, %arg5: memref<16x32xbf16, #tpu.memory_space<vmem>>, %arg6: memref<16x32xbf16, #tpu.memory_space<vmem>>, %arg7: memref<16x32xbf16, #tpu.memory_space<vmem>>) attributes {dimension_semantics = [#tpu.dimension_semantics<parallel>], iteration_bounds = array<i64: 1>, scalar_prefetch = 0 : i64, scratch_operands = 0 : i64, tpu.core_type = #tpu.core_type<tc>, window_params = [{transform_indices = @transform_0, window_bounds = array<i64: 16, 32>}, {pipeline_mode = #tpu.pipeline_mode<synchronous>, transform_indices = @transform_1, window_bounds = array<i64: 1, 32>}, {pipeline_mode = #tpu.pipeline_mode<synchronous>, transform_indices = @transform_2, window_bounds = array<i64: 1, 32>}, {pipeline_mode = #tpu.pipeline_mode<synchronous>, transform_indices = @transform_3, window_bounds = array<i64: 32, 96>}, {transform_indices = @transform_4, window_bounds = array<i64: 16, 32>}, {transform_indices = @transform_5, window_bounds = array<i64: 16, 32>}, {transform_indices = @transform_6, window_bounds = array<i64: 16, 32>}]} {
    %c0 = arith.constant 0 : index
    %c0_0 = arith.constant 0 : index
    %0 = vector.load %arg1[%c0, %c0_0] : memref<16x32xf32, #tpu.memory_space<vmem>>, vector<16x32xf32>
    %cst = arith.constant dense<0.000000e+00> : vector<16xf32>
    %1 = vector.multi_reduction <add>, %0, %cst [1] : vector<16x32xf32> to vector<16xf32>
    %2 = vector.shape_cast %1 : vector<16xf32> to vector<16x1xf32>
    %cst_1 = arith.constant 3.200000e+01 : f32
    %3 = vector.broadcast %cst_1 : f32 to vector<16x1xf32>
    %4 = arith.divf %2, %3 : vector<16x1xf32>
    %5 = vector.broadcast %4 : vector<16x1xf32> to vector<16x32xf32>
    %6 = arith.subf %0, %5 : vector<16x32xf32>
    %7 = arith.mulf %6, %6 : vector<16x32xf32>
    %cst_2 = arith.constant dense<0.000000e+00> : vector<16xf32>
    %8 = vector.multi_reduction <add>, %7, %cst_2 [1] : vector<16x32xf32> to vector<16xf32>
    %9 = vector.shape_cast %8 : vector<16xf32> to vector<16x1xf32>
    %cst_3 = arith.constant 3.200000e+01 : f32
    %10 = vector.broadcast %cst_3 : f32 to vector<16x1xf32>
    %11 = arith.divf %9, %10 : vector<16x1xf32>
    %12 = vector.broadcast %4 : vector<16x1xf32> to vector<16x32xf32>
    %13 = arith.subf %0, %12 : vector<16x32xf32>
    %cst_4 = arith.constant 9.99999974E-6 : f32
    %14 = vector.broadcast %cst_4 : f32 to vector<16x1xf32>
    %15 = arith.addf %11, %14 : vector<16x1xf32>
    %16 = math.rsqrt %15 : vector<16x1xf32>
    %17 = vector.broadcast %16 : vector<16x1xf32> to vector<16x32xf32>
    %18 = arith.mulf %13, %17 : vector<16x32xf32>
    %c0_5 = arith.constant 0 : index
    %c0_6 = arith.constant 0 : index
    %19 = vector.load %arg2[%c0_5, %c0_6] : memref<1x32xf32, #tpu.memory_space<vmem>>, vector<1x32xf32>
    %20 = vector.broadcast %19 : vector<1x32xf32> to vector<16x32xf32>
    %21 = arith.mulf %18, %20 : vector<16x32xf32>
    %c0_7 = arith.constant 0 : index
    %c0_8 = arith.constant 0 : index
    %22 = vector.load %arg3[%c0_7, %c0_8] : memref<1x32xf32, #tpu.memory_space<vmem>>, vector<1x32xf32>
    %23 = vector.broadcast %22 : vector<1x32xf32> to vector<16x32xf32>
    %24 = arith.addf %21, %23 : vector<16x32xf32>
    %25 = arith.truncf %24 : vector<16x32xf32> to vector<16x32xbf16>
    %c0_9 = arith.constant 0 : index
    %c0_10 = arith.constant 0 : index
    %26 = vector.load %arg4[%c0_9, %c0_10] : memref<32x96xbf16, #tpu.memory_space<vmem>>, vector<32x96xbf16>
    %cst_11 = arith.constant dense<0.000000e+00> : vector<16x96xf32>
    %27 = tpu.matmul %25, %26, %cst_11 {dimension_numbers = #tpu.dot_dimension_numbers<[1], [0], [0], [1], [0, 0, 1, 1], [], []>} : vector<16x32xbf16>, vector<32x96xbf16>, vector<16x96xf32> -> vector<16x96xf32>
    %28 = vector.extract_strided_slice %27 {offsets = [0, 0], sizes = [16, 32], strides = [1, 1]} : vector<16x96xf32> to vector<16x32xf32>
    %29 = arith.truncf %28 : vector<16x32xf32> to vector<16x32xbf16>
    %c0_12 = arith.constant 0 : index
    %c0_13 = arith.constant 0 : index
    %30 = vector.load %arg5[%c0_12, %c0_13] : memref<16x32xbf16, #tpu.memory_space<vmem>>, vector<16x32xbf16>
    tpu.vector_store %arg5[%c0_12, %c0_13], %29 {strides = array<i32>} : memref<16x32xbf16, #tpu.memory_space<vmem>>, vector<16x32xbf16>,
    %31 = vector.extract_strided_slice %27 {offsets = [0, 32], sizes = [16, 32], strides = [1, 1]} : vector<16x96xf32> to vector<16x32xf32>
    %32 = arith.truncf %31 : vector<16x32xf32> to vector<16x32xbf16>
    %c0_14 = arith.constant 0 : index
    %c0_15 = arith.constant 0 : index
    %33 = vector.load %arg6[%c0_14, %c0_15] : memref<16x32xbf16, #tpu.memory_space<vmem>>, vector<16x32xbf16>
    tpu.vector_store %arg6[%c0_14, %c0_15], %32 {strides = array<i32>} : memref<16x32xbf16, #tpu.memory_space<vmem>>, vector<16x32xbf16>,
    %34 = vector.extract_strided_slice %27 {offsets = [0, 64], sizes = [16, 32], strides = [1, 1]} : vector<16x96xf32> to vector<16x32xf32>
    %35 = arith.truncf %34 : vector<16x32xf32> to vector<16x32xbf16>
    %c0_16 = arith.constant 0 : index
    %c0_17 = arith.constant 0 : index
    %36 = vector.load %arg7[%c0_16, %c0_17] : memref<16x32xbf16, #tpu.memory_space<vmem>>, vector<16x32xbf16>
    tpu.vector_store %arg7[%c0_16, %c0_17], %35 {strides = array<i32>} : memref<16x32xbf16, #tpu.memory_space<vmem>>, vector<16x32xbf16>,
    return
  }
  func.func @transform_0(%arg0: i32) -> (i32, i32) {
    %c0_i32 = arith.constant 0 : i32
    %c0_i32_0 = arith.constant 0 : i32
    return %arg0, %c0_i32 : i32, i32
  }
  func.func @transform_1(%arg0: i32) -> (i32, i32) {
    %c0_i32 = arith.constant 0 : i32
    %c0_i32_0 = arith.constant 0 : i32
    %c0_i32_1 = arith.constant 0 : i32
    return %c0_i32, %c0_i32_0 : i32, i32
  }
  func.func @transform_2(%arg0: i32) -> (i32, i32) {
    %c0_i32 = arith.constant 0 : i32
    %c0_i32_0 = arith.constant 0 : i32
    %c0_i32_1 = arith.constant 0 : i32
    return %c0_i32, %c0_i32_0 : i32, i32
  }
  func.func @transform_3(%arg0: i32) -> (i32, i32) {
    %c0_i32 = arith.constant 0 : i32
    %c0_i32_0 = arith.constant 0 : i32
    %c0_i32_1 = arith.constant 0 : i32
    return %c0_i32, %c0_i32_0 : i32, i32
  }
  func.func @transform_4(%arg0: i32) -> (i32, i32) {
    %c0_i32 = arith.constant 0 : i32
    %c0_i32_0 = arith.constant 0 : i32
    return %arg0, %c0_i32 : i32, i32
  }
  func.func @transform_5(%arg0: i32) -> (i32, i32) {
    %c0_i32 = arith.constant 0 : i32
    %c0_i32_0 = arith.constant 0 : i32
    return %arg0, %c0_i32 : i32, i32
  }
  func.func @transform_6(%arg0: i32) -> (i32, i32) {
    %c0_i32 = arith.constant 0 : i32
    %c0_i32_0 = arith.constant 0 : i32
    return %arg0, %c0_i32 : i32, i32
  }
}

module attributes {stable_mosaic.version = 11 : i64} {
  func.func @kernel(%arg0: i32, %arg1: i32, %arg2: memref<16x32xbf16, #tpu.memory_space<vmem>>, %arg3: memref<32x32xbf16, #tpu.memory_space<vmem>>, %arg4: memref<1x32xf32, #tpu.memory_space<vmem>>, %arg5: memref<16x32xf32, #tpu.memory_space<vmem>>, %arg6: memref<16x32xf32, #tpu.memory_space<vmem>>) attributes {dimension_semantics = [#tpu.dimension_semantics<parallel>, #tpu.dimension_semantics<parallel>], iteration_bounds = array<i64: 1, 1>, scalar_prefetch = 0 : i64, scratch_operands = 0 : i64, tpu.core_type = #tpu.core_type<tc>, window_params = [{transform_indices = @transform_0, window_bounds = array<i64: 16, 32>}, {transform_indices = @transform_1, window_bounds = array<i64: 32, 32>}, {transform_indices = @transform_2, window_bounds = array<i64: 1, 32>}, {transform_indices = @transform_3, window_bounds = array<i64: 16, 32>}, {transform_indices = @transform_4, window_bounds = array<i64: 16, 32>}]} {
    %c0 = arith.constant 0 : index
    %c0_0 = arith.constant 0 : index
    %0 = vector.load %arg2[%c0, %c0_0] : memref<16x32xbf16, #tpu.memory_space<vmem>>, vector<16x32xbf16>
    %1 = arith.extf %0 : vector<16x32xbf16> to vector<16x32xf32>
    %2 = arith.truncf %1 : vector<16x32xf32> to vector<16x32xbf16>
    %c0_1 = arith.constant 0 : index
    %c0_2 = arith.constant 0 : index
    %3 = vector.load %arg3[%c0_1, %c0_2] : memref<32x32xbf16, #tpu.memory_space<vmem>>, vector<32x32xbf16>
    %cst = arith.constant dense<0.000000e+00> : vector<16x32xf32>
    %4 = tpu.matmul %2, %3, %cst {dimension_numbers = #tpu.dot_dimension_numbers<[1], [0], [0], [1], [0, 0, 1, 1], [], []>} : vector<16x32xbf16>, vector<32x32xbf16>, vector<16x32xf32> -> vector<16x32xf32>
    %c0_3 = arith.constant 0 : index
    %c0_4 = arith.constant 0 : index
    %5 = vector.load %arg4[%c0_3, %c0_4] : memref<1x32xf32, #tpu.memory_space<vmem>>, vector<1x32xf32>
    %6 = vector.broadcast %5 : vector<1x32xf32> to vector<16x32xf32>
    %7 = arith.addf %4, %6 : vector<16x32xf32>
    %c0_5 = arith.constant 0 : index
    %c0_6 = arith.constant 0 : index
    %8 = vector.load %arg5[%c0_5, %c0_6] : memref<16x32xf32, #tpu.memory_space<vmem>>, vector<16x32xf32>
    %9 = arith.addf %7, %8 : vector<16x32xf32>
    %c0_7 = arith.constant 0 : index
    %c0_8 = arith.constant 0 : index
    %10 = vector.load %arg6[%c0_7, %c0_8] : memref<16x32xf32, #tpu.memory_space<vmem>>, vector<16x32xf32>
    tpu.vector_store %arg6[%c0_7, %c0_8], %9 {strides = array<i32>} : memref<16x32xf32, #tpu.memory_space<vmem>>, vector<16x32xf32>,
    return
  }
  func.func @transform_0(%arg0: i32, %arg1: i32) -> (i32, i32) {
    %c0_i32 = arith.constant 0 : i32
    %c0_i32_0 = arith.constant 0 : i32
    return %arg0, %c0_i32 : i32, i32
  }
  func.func @transform_1(%arg0: i32, %arg1: i32) -> (i32, i32) {
    %c0_i32 = arith.constant 0 : i32
    %c0_i32_0 = arith.constant 0 : i32
    return %c0_i32, %arg1 : i32, i32
  }
  func.func @transform_2(%arg0: i32, %arg1: i32) -> (i32, i32) {
    %c0_i32 = arith.constant 0 : i32
    %c0_i32_0 = arith.constant 0 : i32
    return %c0_i32, %arg1 : i32, i32
  }
  func.func @transform_3(%arg0: i32, %arg1: i32) -> (i32, i32) {
    %c0_i32 = arith.constant 0 : i32
    return %arg0, %arg1 : i32, i32
  }
  func.func @transform_4(%arg0: i32, %arg1: i32) -> (i32, i32) {
    %c0_i32 = arith.constant 0 : i32
    return %arg0, %arg1 : i32, i32
  }
}

module attributes {stable_mosaic.version = 11 : i64} {
  func.func @kernel(%arg0: i32, %arg1: i32, %arg2: i32, %arg3: memref<1x8x32xbf16, #tpu.memory_space<vmem>>, %arg4: memref<1x8x32xbf16, #tpu.memory_space<vmem>>, %arg5: memref<1x8x32xbf16, #tpu.memory_space<vmem>>, %arg6: memref<1x8x32xbf16, #tpu.memory_space<vmem>>, %arg7: memref<4x8x1xf32, #tpu.memory_space<vmem>>, %arg8: memref<4x8x1xf32, #tpu.memory_space<vmem>>, %arg9: memref<4x8x8xf32, #tpu.memory_space<vmem>>) attributes {dimension_semantics = [#tpu.dimension_semantics<parallel>, #tpu.dimension_semantics<parallel>, #tpu.dimension_semantics<arbitrary>], iteration_bounds = array<i64: 2, 1, 1>, scalar_prefetch = 0 : i64, scratch_operands = 3 : i64, tpu.core_type = #tpu.core_type<tc>, window_params = [{transform_indices = @transform_0, window_bounds = array<i64: 1, 8, 32>}, {transform_indices = @transform_1, window_bounds = array<i64: 1, 8, 32>}, {transform_indices = @transform_2, window_bounds = array<i64: 1, 8, 32>}, {transform_indices = @transform_3, window_bounds = array<i64: 1, 8, 32>}]} {
    %c8_i32 = arith.constant 8 : i32
    %0 = arith.muli %arg1, %c8_i32 : i32
    %c8_i32_0 = arith.constant 8 : i32
    %1 = arith.muli %arg2, %c8_i32_0 : i32
    %c0_i32 = arith.constant 0 : i32
    %2 = arith.cmpi eq, %arg2, %c0_i32 : i32
    %3 = arith.extui %2 : i1 to i32
    %c0_i32_1 = arith.constant 0 : i32
    %4 = arith.cmpi ne, %3, %c0_i32_1 : i32
    scf.if %4 {
      %cst = arith.constant -1.000000e+30 : f32
      %12 = vector.broadcast %cst : f32 to vector<4x8x1xf32>
      %c0 = arith.constant 0 : index
      %c0_5 = arith.constant 0 : index
      %c0_6 = arith.constant 0 : index
      %13 = vector.load %arg7[%c0, %c0_5, %c0_6] : memref<4x8x1xf32, #tpu.memory_space<vmem>>, vector<4x8x1xf32>
      tpu.vector_store %arg7[%c0, %c0_5, %c0_6], %12 {strides = array<i32>} : memref<4x8x1xf32, #tpu.memory_space<vmem>>, vector<4x8x1xf32>,
      %cst_7 = arith.constant 0.000000e+00 : f32
      %14 = vector.broadcast %cst_7 : f32 to vector<4x8x1xf32>
      %c0_8 = arith.constant 0 : index
      %c0_9 = arith.constant 0 : index
      %c0_10 = arith.constant 0 : index
      %15 = vector.load %arg8[%c0_8, %c0_9, %c0_10] : memref<4x8x1xf32, #tpu.memory_space<vmem>>, vector<4x8x1xf32>
      tpu.vector_store %arg8[%c0_8, %c0_9, %c0_10], %14 {strides = array<i32>} : memref<4x8x1xf32, #tpu.memory_space<vmem>>, vector<4x8x1xf32>,
      %cst_11 = arith.constant 0.000000e+00 : f32
      %16 = vector.broadcast %cst_11 : f32 to vector<4x8x8xf32>
      %c0_12 = arith.constant 0 : index
      %c0_13 = arith.constant 0 : index
      %c0_14 = arith.constant 0 : index
      %17 = vector.load %arg9[%c0_12, %c0_13, %c0_14] : memref<4x8x8xf32, #tpu.memory_space<vmem>>, vector<4x8x8xf32>
      tpu.vector_store %arg9[%c0_12, %c0_13, %c0_14], %16 {strides = array<i32>} : memref<4x8x8xf32, #tpu.memory_space<vmem>>, vector<4x8x8xf32>,
    } else {
    }
    %c7_i32 = arith.constant 7 : i32
    %5 = arith.addi %0, %c7_i32 : i32
    %6 = arith.cmpi sle, %1, %5 : i32
    %7 = arith.extui %6 : i1 to i32
    %c0_i32_2 = arith.constant 0 : i32
    %8 = arith.cmpi ne, %7, %c0_i32_2 : i32
    scf.if %8 {
      %12 = tpu.iota {dimensions = array<i32: 0>} : vector<8x8xi32>
      %13 = vector.broadcast %0 : i32 to vector<8x8xi32>
      %14 = arith.addi %13, %12 : vector<8x8xi32>
      %15 = tpu.iota {dimensions = array<i32: 1>} : vector<8x8xi32>
      %16 = vector.broadcast %1 : i32 to vector<8x8xi32>
      %17 = arith.addi %16, %15 : vector<8x8xi32>
      %18 = arith.cmpi sge, %14, %17 : vector<8x8xi32>
      %c0 = arith.constant 0 : index
      %c0_5 = arith.constant 0 : index
      %c0_6 = arith.constant 0 : index
      %19 = vector.load %arg3[%c0, %c0_5, %c0_6] : memref<1x8x32xbf16, #tpu.memory_space<vmem>>, vector<1x8x8xbf16>
      %20 = vector.shape_cast %19 : vector<1x8x8xbf16> to vector<8x8xbf16>
      %c0_7 = arith.constant 0 : index
      %c0_8 = arith.constant 0 : index
      %c0_9 = arith.constant 0 : index
      %21 = vector.load %arg4[%c0_7, %c0_8, %c0_9] : memref<1x8x32xbf16, #tpu.memory_space<vmem>>, vector<1x8x8xbf16>
      %22 = vector.shape_cast %21 : vector<1x8x8xbf16> to vector<8x8xbf16>
      %c0_10 = arith.constant 0 : index
      %c0_11 = arith.constant 0 : index
      %c0_12 = arith.constant 0 : index
      %23 = vector.load %arg5[%c0_10, %c0_11, %c0_12] : memref<1x8x32xbf16, #tpu.memory_space<vmem>>, vector<1x8x8xbf16>
      %24 = vector.shape_cast %23 : vector<1x8x8xbf16> to vector<8x8xbf16>
      %cst = arith.constant dense<0.000000e+00> : vector<8x8xf32>
      %25 = tpu.matmul %20, %22, %cst {dimension_numbers = #tpu.dot_dimension_numbers<[1], [1], [0], [0], [0, 0, 1, 0], [], []>} : vector<8x8xbf16>, vector<8x8xbf16>, vector<8x8xf32> -> vector<8x8xf32>
      %cst_13 = arith.constant 0.353553385 : f32
      %26 = vector.broadcast %cst_13 : f32 to vector<8x8xf32>
      %27 = arith.mulf %25, %26 : vector<8x8xf32>
      %cst_14 = arith.constant -1.000000e+30 : f32
      %28 = vector.broadcast %cst_14 : f32 to vector<8x8xf32>
      %29 = arith.select %18, %27, %28 : vector<8x8xi1>, vector<8x8xf32>
      %c0_15 = arith.constant 0 : index
      %c0_16 = arith.constant 0 : index
      %c0_17 = arith.constant 0 : index
      %30 = vector.load %arg7[%c0_15, %c0_16, %c0_17] : memref<4x8x1xf32, #tpu.memory_space<vmem>>, vector<1x8x1xf32>
      %31 = vector.shape_cast %30 : vector<1x8x1xf32> to vector<8x1xf32>
      %cst_18 = arith.constant dense<0xFF800000> : vector<8xf32>
      %32 = vector.multi_reduction <maximumf>, %29, %cst_18 [1] : vector<8x8xf32> to vector<8xf32>
      %33 = vector.shape_cast %32 : vector<8xf32> to vector<8x1xf32>
      %34 = arith.maximumf %31, %33 : vector<8x1xf32>
      %35 = arith.subf %31, %34 : vector<8x1xf32>
      %36 = math.exp %35 : vector<8x1xf32>
      %37 = vector.broadcast %34 : vector<8x1xf32> to vector<8x8xf32>
      %38 = arith.subf %29, %37 : vector<8x8xf32>
      %39 = math.exp %38 : vector<8x8xf32>
      %c0_19 = arith.constant 0 : index
      %c0_20 = arith.constant 0 : index
      %c0_21 = arith.constant 0 : index
      %40 = vector.load %arg8[%c0_19, %c0_20, %c0_21] : memref<4x8x1xf32, #tpu.memory_space<vmem>>, vector<1x8x1xf32>
      %41 = vector.shape_cast %40 : vector<1x8x1xf32> to vector<8x1xf32>
      %42 = arith.mulf %36, %41 : vector<8x1xf32>
      %cst_22 = arith.constant dense<0.000000e+00> : vector<8xf32>
      %43 = vector.multi_reduction <add>, %39, %cst_22 [1] : vector<8x8xf32> to vector<8xf32>
      %44 = vector.shape_cast %43 : vector<8xf32> to vector<8x1xf32>
      %45 = arith.addf %42, %44 : vector<8x1xf32>
      %c0_23 = arith.constant 0 : index
      %c0_24 = arith.constant 0 : index
      %c0_25 = arith.constant 0 : index
      %46 = vector.load %arg8[%c0_23, %c0_24, %c0_25] : memref<4x8x1xf32, #tpu.memory_space<vmem>>, vector<1x8x1xf32>
      %47 = vector.shape_cast %46 : vector<1x8x1xf32> to vector<8x1xf32>
      %48 = vector.shape_cast %45 : vector<8x1xf32> to vector<1x8x1xf32>
      tpu.vector_store %arg8[%c0_23, %c0_24, %c0_25], %48 {strides = array<i32>} : memref<4x8x1xf32, #tpu.memory_space<vmem>>, vector<1x8x1xf32>,
      %c0_26 = arith.constant 0 : index
      %c0_27 = arith.constant 0 : index
      %c0_28 = arith.constant 0 : index
      %49 = vector.load %arg9[%c0_26, %c0_27, %c0_28] : memref<4x8x8xf32, #tpu.memory_space<vmem>>, vector<1x8x8xf32>
      %50 = vector.shape_cast %49 : vector<1x8x8xf32> to vector<8x8xf32>
      %51 = vector.broadcast %36 : vector<8x1xf32> to vector<8x8xf32>
      %52 = arith.mulf %51, %50 : vector<8x8xf32>
      %53 = arith.truncf %39 : vector<8x8xf32> to vector<8x8xbf16>
      %cst_29 = arith.constant dense<0.000000e+00> : vector<8x8xf32>
      %54 = tpu.matmul %53, %24, %cst_29 {dimension_numbers = #tpu.dot_dimension_numbers<[1], [0], [0], [1], [0, 0, 1, 1], [], []>} : vector<8x8xbf16>, vector<8x8xbf16>, vector<8x8xf32> -> vector<8x8xf32>
      %55 = arith.addf %52, %54 : vector<8x8xf32>
      %c0_30 = arith.constant 0 : index
      %c0_31 = arith.constant 0 : index
      %c0_32 = arith.constant 0 : index
      %56 = vector.load %arg9[%c0_30, %c0_31, %c0_32] : memref<4x8x8xf32, #tpu.memory_space<vmem>>, vector<1x8x8xf32>
      %57 = vector.shape_cast %56 : vector<1x8x8xf32> to vector<8x8xf32>
      %58 = vector.shape_cast %55 : vector<8x8xf32> to vector<1x8x8xf32>
      tpu.vector_store %arg9[%c0_30, %c0_31, %c0_32], %58 {strides = array<i32>} : memref<4x8x8xf32, #tpu.memory_space<vmem>>, vector<1x8x8xf32>,
      %c0_33 = arith.constant 0 : index
      %c0_34 = arith.constant 0 : index
      %c0_35 = arith.constant 0 : index
      %59 = vector.load %arg7[%c0_33, %c0_34, %c0_35] : memref<4x8x1xf32, #tpu.memory_space<vmem>>, vector<1x8x1xf32>
      %60 = vector.shape_cast %59 : vector<1x8x1xf32> to vector<8x1xf32>
      %61 = vector.shape_cast %34 : vector<8x1xf32> to vector<1x8x1xf32>
      tpu.vector_store %arg7[%c0_33, %c0_34, %c0_35], %61 {strides = array<i32>} : memref<4x8x1xf32, #tpu.memory_space<vmem>>, vector<1x8x1xf32>,
      %c0_36 = arith.constant 0 : index
      %c0_37 = arith.constant 0 : index
      %c8 = arith.constant 8 : index
      %62 = vector.load %arg3[%c0_36, %c0_37, %c8] : memref<1x8x32xbf16, #tpu.memory_space<vmem>>, vector<1x8x8xbf16>
      %63 = vector.shape_cast %62 : vector<1x8x8xbf16> to vector<8x8xbf16>
      %c0_38 = arith.constant 0 : index
      %c0_39 = arith.constant 0 : index
      %c8_40 = arith.constant 8 : index
      %64 = vector.load %arg4[%c0_38, %c0_39, %c8_40] : memref<1x8x32xbf16, #tpu.memory_space<vmem>>, vector<1x8x8xbf16>
      %65 = vector.shape_cast %64 : vector<1x8x8xbf16> to vector<8x8xbf16>
      %c0_41 = arith.constant 0 : index
      %c0_42 = arith.constant 0 : index
      %c8_43 = arith.constant 8 : index
      %66 = vector.load %arg5[%c0_41, %c0_42, %c8_43] : memref<1x8x32xbf16, #tpu.memory_space<vmem>>, vector<1x8x8xbf16>
      %67 = vector.shape_cast %66 : vector<1x8x8xbf16> to vector<8x8xbf16>
      %cst_44 = arith.constant dense<0.000000e+00> : vector<8x8xf32>
      %68 = tpu.matmul %63, %65, %cst_44 {dimension_numbers = #tpu.dot_dimension_numbers<[1], [1], [0], [0], [0, 0, 1, 0], [], []>} : vector<8x8xbf16>, vector<8x8xbf16>, vector<8x8xf32> -> vector<8x8xf32>
      %cst_45 = arith.constant 0.353553385 : f32
      %69 = vector.broadcast %cst_45 : f32 to vector<8x8xf32>
      %70 = arith.mulf %68, %69 : vector<8x8xf32>
      %cst_46 = arith.constant -1.000000e+30 : f32
      %71 = vector.broadcast %cst_46 : f32 to vector<8x8xf32>
      %72 = arith.select %18, %70, %71 : vector<8x8xi1>, vector<8x8xf32>
      %c1 = arith.constant 1 : index
      %c0_47 = arith.constant 0 : index
      %c0_48 = arith.constant 0 : index
      %73 = vector.load %arg7[%c1, %c0_47, %c0_48] : memref<4x8x1xf32, #tpu.memory_space<vmem>>, vector<1x8x1xf32>
      %74 = vector.shape_cast %73 : vector<1x8x1xf32> to vector<8x1xf32>
      %cst_49 = arith.constant dense<0xFF800000> : vector<8xf32>
      %75 = vector.multi_reduction <maximumf>, %72, %cst_49 [1] : vector<8x8xf32> to vector<8xf32>
      %76 = vector.shape_cast %75 : vector<8xf32> to vector<8x1xf32>
      %77 = arith.maximumf %74, %76 : vector<8x1xf32>
      %78 = arith.subf %74, %77 : vector<8x1xf32>
      %79 = math.exp %78 : vector<8x1xf32>
      %80 = vector.broadcast %77 : vector<8x1xf32> to vector<8x8xf32>
      %81 = arith.subf %72, %80 : vector<8x8xf32>
      %82 = math.exp %81 : vector<8x8xf32>
      %c1_50 = arith.constant 1 : index
      %c0_51 = arith.constant 0 : index
      %c0_52 = arith.constant 0 : index
      %83 = vector.load %arg8[%c1_50, %c0_51, %c0_52] : memref<4x8x1xf32, #tpu.memory_space<vmem>>, vector<1x8x1xf32>
      %84 = vector.shape_cast %83 : vector<1x8x1xf32> to vector<8x1xf32>
      %85 = arith.mulf %79, %84 : vector<8x1xf32>
      %cst_53 = arith.constant dense<0.000000e+00> : vector<8xf32>
      %86 = vector.multi_reduction <add>, %82, %cst_53 [1] : vector<8x8xf32> to vector<8xf32>
      %87 = vector.shape_cast %86 : vector<8xf32> to vector<8x1xf32>
      %88 = arith.addf %85, %87 : vector<8x1xf32>
      %c1_54 = arith.constant 1 : index
      %c0_55 = arith.constant 0 : index
      %c0_56 = arith.constant 0 : index
      %89 = vector.load %arg8[%c1_54, %c0_55, %c0_56] : memref<4x8x1xf32, #tpu.memory_space<vmem>>, vector<1x8x1xf32>
      %90 = vector.shape_cast %89 : vector<1x8x1xf32> to vector<8x1xf32>
      %91 = vector.shape_cast %88 : vector<8x1xf32> to vector<1x8x1xf32>
      tpu.vector_store %arg8[%c1_54, %c0_55, %c0_56], %91 {strides = array<i32>} : memref<4x8x1xf32, #tpu.memory_space<vmem>>, vector<1x8x1xf32>,
      %c1_57 = arith.constant 1 : index
      %c0_58 = arith.constant 0 : index
      %c0_59 = arith.constant 0 : index
      %92 = vector.load %arg9[%c1_57, %c0_58, %c0_59] : memref<4x8x8xf32, #tpu.memory_space<vmem>>, vector<1x8x8xf32>
      %93 = vector.shape_cast %92 : vector<1x8x8xf32> to vector<8x8xf32>
      %94 = vector.broadcast %79 : vector<8x1xf32> to vector<8x8xf32>
      %95 = arith.mulf %94, %93 : vector<8x8xf32>
      %96 = arith.truncf %82 : vector<8x8xf32> to vector<8x8xbf16>
      %cst_60 = arith.constant dense<0.000000e+00> : vector<8x8xf32>
      %97 = tpu.matmul %96, %67, %cst_60 {dimension_numbers = #tpu.dot_dimension_numbers<[1], [0], [0], [1], [0, 0, 1, 1], [], []>} : vector<8x8xbf16>, vector<8x8xbf16>, vector<8x8xf32> -> vector<8x8xf32>
      %98 = arith.addf %95, %97 : vector<8x8xf32>
      %c1_61 = arith.constant 1 : index
      %c0_62 = arith.constant 0 : index
      %c0_63 = arith.constant 0 : index
      %99 = vector.load %arg9[%c1_61, %c0_62, %c0_63] : memref<4x8x8xf32, #tpu.memory_space<vmem>>, vector<1x8x8xf32>
      %100 = vector.shape_cast %99 : vector<1x8x8xf32> to vector<8x8xf32>
      %101 = vector.shape_cast %98 : vector<8x8xf32> to vector<1x8x8xf32>
      tpu.vector_store %arg9[%c1_61, %c0_62, %c0_63], %101 {strides = array<i32>} : memref<4x8x8xf32, #tpu.memory_space<vmem>>, vector<1x8x8xf32>,
      %c1_64 = arith.constant 1 : index
      %c0_65 = arith.constant 0 : index
      %c0_66 = arith.constant 0 : index
      %102 = vector.load %arg7[%c1_64, %c0_65, %c0_66] : memref<4x8x1xf32, #tpu.memory_space<vmem>>, vector<1x8x1xf32>
      %103 = vector.shape_cast %102 : vector<1x8x1xf32> to vector<8x1xf32>
      %104 = vector.shape_cast %77 : vector<8x1xf32> to vector<1x8x1xf32>
      tpu.vector_store %arg7[%c1_64, %c0_65, %c0_66], %104 {strides = array<i32>} : memref<4x8x1xf32, #tpu.memory_space<vmem>>, vector<1x8x1xf32>,
      %c0_67 = arith.constant 0 : index
      %c0_68 = arith.constant 0 : index
      %c16 = arith.constant 16 : index
      %105 = vector.load %arg3[%c0_67, %c0_68, %c16] : memref<1x8x32xbf16, #tpu.memory_space<vmem>>, vector<1x8x8xbf16>
      %106 = vector.shape_cast %105 : vector<1x8x8xbf16> to vector<8x8xbf16>
      %c0_69 = arith.constant 0 : index
      %c0_70 = arith.constant 0 : index
      %c16_71 = arith.constant 16 : index
      %107 = vector.load %arg4[%c0_69, %c0_70, %c16_71] : memref<1x8x32xbf16, #tpu.memory_space<vmem>>, vector<1x8x8xbf16>
      %108 = vector.shape_cast %107 : vector<1x8x8xbf16> to vector<8x8xbf16>
      %c0_72 = arith.constant 0 : index
      %c0_73 = arith.constant 0 : index
      %c16_74 = arith.constant 16 : index
      %109 = vector.load %arg5[%c0_72, %c0_73, %c16_74] : memref<1x8x32xbf16, #tpu.memory_space<vmem>>, vector<1x8x8xbf16>
      %110 = vector.shape_cast %109 : vector<1x8x8xbf16> to vector<8x8xbf16>
      %cst_75 = arith.constant dense<0.000000e+00> : vector<8x8xf32>
      %111 = tpu.matmul %106, %108, %cst_75 {dimension_numbers = #tpu.dot_dimension_numbers<[1], [1], [0], [0], [0, 0, 1, 0], [], []>} : vector<8x8xbf16>, vector<8x8xbf16>, vector<8x8xf32> -> vector<8x8xf32>
      %cst_76 = arith.constant 0.353553385 : f32
      %112 = vector.broadcast %cst_76 : f32 to vector<8x8xf32>
      %113 = arith.mulf %111, %112 : vector<8x8xf32>
      %cst_77 = arith.constant -1.000000e+30 : f32
      %114 = vector.broadcast %cst_77 : f32 to vector<8x8xf32>
      %115 = arith.select %18, %113, %114 : vector<8x8xi1>, vector<8x8xf32>
      %c2 = arith.constant 2 : index
      %c0_78 = arith.constant 0 : index
      %c0_79 = arith.constant 0 : index
      %116 = vector.load %arg7[%c2, %c0_78, %c0_79] : memref<4x8x1xf32, #tpu.memory_space<vmem>>, vector<1x8x1xf32>
      %117 = vector.shape_cast %116 : vector<1x8x1xf32> to vector<8x1xf32>
      %cst_80 = arith.constant dense<0xFF800000> : vector<8xf32>
      %118 = vector.multi_reduction <maximumf>, %115, %cst_80 [1] : vector<8x8xf32> to vector<8xf32>
      %119 = vector.shape_cast %118 : vector<8xf32> to vector<8x1xf32>
      %120 = arith.maximumf %117, %119 : vector<8x1xf32>
      %121 = arith.subf %117, %120 : vector<8x1xf32>
      %122 = math.exp %121 : vector<8x1xf32>
      %123 = vector.broadcast %120 : vector<8x1xf32> to vector<8x8xf32>
      %124 = arith.subf %115, %123 : vector<8x8xf32>
      %125 = math.exp %124 : vector<8x8xf32>
      %c2_81 = arith.constant 2 : index
      %c0_82 = arith.constant 0 : index
      %c0_83 = arith.constant 0 : index
      %126 = vector.load %arg8[%c2_81, %c0_82, %c0_83] : memref<4x8x1xf32, #tpu.memory_space<vmem>>, vector<1x8x1xf32>
      %127 = vector.shape_cast %126 : vector<1x8x1xf32> to vector<8x1xf32>
      %128 = arith.mulf %122, %127 : vector<8x1xf32>
      %cst_84 = arith.constant dense<0.000000e+00> : vector<8xf32>
      %129 = vector.multi_reduction <add>, %125, %cst_84 [1] : vector<8x8xf32> to vector<8xf32>
      %130 = vector.shape_cast %129 : vector<8xf32> to vector<8x1xf32>
      %131 = arith.addf %128, %130 : vector<8x1xf32>
      %c2_85 = arith.constant 2 : index
      %c0_86 = arith.constant 0 : index
      %c0_87 = arith.constant 0 : index
      %132 = vector.load %arg8[%c2_85, %c0_86, %c0_87] : memref<4x8x1xf32, #tpu.memory_space<vmem>>, vector<1x8x1xf32>
      %133 = vector.shape_cast %132 : vector<1x8x1xf32> to vector<8x1xf32>
      %134 = vector.shape_cast %131 : vector<8x1xf32> to vector<1x8x1xf32>
      tpu.vector_store %arg8[%c2_85, %c0_86, %c0_87], %134 {strides = array<i32>} : memref<4x8x1xf32, #tpu.memory_space<vmem>>, vector<1x8x1xf32>,
      %c2_88 = arith.constant 2 : index
      %c0_89 = arith.constant 0 : index
      %c0_90 = arith.constant 0 : index
      %135 = vector.load %arg9[%c2_88, %c0_89, %c0_90] : memref<4x8x8xf32, #tpu.memory_space<vmem>>, vector<1x8x8xf32>
      %136 = vector.shape_cast %135 : vector<1x8x8xf32> to vector<8x8xf32>
      %137 = vector.broadcast %122 : vector<8x1xf32> to vector<8x8xf32>
      %138 = arith.mulf %137, %136 : vector<8x8xf32>
      %139 = arith.truncf %125 : vector<8x8xf32> to vector<8x8xbf16>
      %cst_91 = arith.constant dense<0.000000e+00> : vector<8x8xf32>
      %140 = tpu.matmul %139, %110, %cst_91 {dimension_numbers = #tpu.dot_dimension_numbers<[1], [0], [0], [1], [0, 0, 1, 1], [], []>} : vector<8x8xbf16>, vector<8x8xbf16>, vector<8x8xf32> -> vector<8x8xf32>
      %141 = arith.addf %138, %140 : vector<8x8xf32>
      %c2_92 = arith.constant 2 : index
      %c0_93 = arith.constant 0 : index
      %c0_94 = arith.constant 0 : index
      %142 = vector.load %arg9[%c2_92, %c0_93, %c0_94] : memref<4x8x8xf32, #tpu.memory_space<vmem>>, vector<1x8x8xf32>
      %143 = vector.shape_cast %142 : vector<1x8x8xf32> to vector<8x8xf32>
      %144 = vector.shape_cast %141 : vector<8x8xf32> to vector<1x8x8xf32>
      tpu.vector_store %arg9[%c2_92, %c0_93, %c0_94], %144 {strides = array<i32>} : memref<4x8x8xf32, #tpu.memory_space<vmem>>, vector<1x8x8xf32>,
      %c2_95 = arith.constant 2 : index
      %c0_96 = arith.constant 0 : index
      %c0_97 = arith.constant 0 : index
      %145 = vector.load %arg7[%c2_95, %c0_96, %c0_97] : memref<4x8x1xf32, #tpu.memory_space<vmem>>, vector<1x8x1xf32>
      %146 = vector.shape_cast %145 : vector<1x8x1xf32> to vector<8x1xf32>
      %147 = vector.shape_cast %120 : vector<8x1xf32> to vector<1x8x1xf32>
      tpu.vector_store %arg7[%c2_95, %c0_96, %c0_97], %147 {strides = array<i32>} : memref<4x8x1xf32, #tpu.memory_space<vmem>>, vector<1x8x1xf32>,
      %c0_98 = arith.constant 0 : index
      %c0_99 = arith.constant 0 : index
      %c24 = arith.constant 24 : index
      %148 = vector.load %arg3[%c0_98, %c0_99, %c24] : memref<1x8x32xbf16, #tpu.memory_space<vmem>>, vector<1x8x8xbf16>
      %149 = vector.shape_cast %148 : vector<1x8x8xbf16> to vector<8x8xbf16>
      %c0_100 = arith.constant 0 : index
      %c0_101 = arith.constant 0 : index
      %c24_102 = arith.constant 24 : index
      %150 = vector.load %arg4[%c0_100, %c0_101, %c24_102] : memref<1x8x32xbf16, #tpu.memory_space<vmem>>, vector<1x8x8xbf16>
      %151 = vector.shape_cast %150 : vector<1x8x8xbf16> to vector<8x8xbf16>
      %c0_103 = arith.constant 0 : index
      %c0_104 = arith.constant 0 : index
      %c24_105 = arith.constant 24 : index
      %152 = vector.load %arg5[%c0_103, %c0_104, %c24_105] : memref<1x8x32xbf16, #tpu.memory_space<vmem>>, vector<1x8x8xbf16>
      %153 = vector.shape_cast %152 : vector<1x8x8xbf16> to vector<8x8xbf16>
      %cst_106 = arith.constant dense<0.000000e+00> : vector<8x8xf32>
      %154 = tpu.matmul %149, %151, %cst_106 {dimension_numbers = #tpu.dot_dimension_numbers<[1], [1], [0], [0], [0, 0, 1, 0], [], []>} : vector<8x8xbf16>, vector<8x8xbf16>, vector<8x8xf32> -> vector<8x8xf32>
      %cst_107 = arith.constant 0.353553385 : f32
      %155 = vector.broadcast %cst_107 : f32 to vector<8x8xf32>
      %156 = arith.mulf %154, %155 : vector<8x8xf32>
      %cst_108 = arith.constant -1.000000e+30 : f32
      %157 = vector.broadcast %cst_108 : f32 to vector<8x8xf32>
      %158 = arith.select %18, %156, %157 : vector<8x8xi1>, vector<8x8xf32>
      %c3 = arith.constant 3 : index
      %c0_109 = arith.constant 0 : index
      %c0_110 = arith.constant 0 : index
      %159 = vector.load %arg7[%c3, %c0_109, %c0_110] : memref<4x8x1xf32, #tpu.memory_space<vmem>>, vector<1x8x1xf32>
      %160 = vector.shape_cast %159 : vector<1x8x1xf32> to vector<8x1xf32>
      %cst_111 = arith.constant dense<0xFF800000> : vector<8xf32>
      %161 = vector.multi_reduction <maximumf>, %158, %cst_111 [1] : vector<8x8xf32> to vector<8xf32>
      %162 = vector.shape_cast %161 : vector<8xf32> to vector<8x1xf32>
      %163 = arith.maximumf %160, %162 : vector<8x1xf32>
      %164 = arith.subf %160, %163 : vector<8x1xf32>
      %165 = math.exp %164 : vector<8x1xf32>
      %166 = vector.broadcast %163 : vector<8x1xf32> to vector<8x8xf32>
      %167 = arith.subf %158, %166 : vector<8x8xf32>
      %168 = math.exp %167 : vector<8x8xf32>
      %c3_112 = arith.constant 3 : index
      %c0_113 = arith.constant 0 : index
      %c0_114 = arith.constant 0 : index
      %169 = vector.load %arg8[%c3_112, %c0_113, %c0_114] : memref<4x8x1xf32, #tpu.memory_space<vmem>>, vector<1x8x1xf32>
      %170 = vector.shape_cast %169 : vector<1x8x1xf32> to vector<8x1xf32>
      %171 = arith.mulf %165, %170 : vector<8x1xf32>
      %cst_115 = arith.constant dense<0.000000e+00> : vector<8xf32>
      %172 = vector.multi_reduction <add>, %168, %cst_115 [1] : vector<8x8xf32> to vector<8xf32>
      %173 = vector.shape_cast %172 : vector<8xf32> to vector<8x1xf32>
      %174 = arith.addf %171, %173 : vector<8x1xf32>
      %c3_116 = arith.constant 3 : index
      %c0_117 = arith.constant 0 : index
      %c0_118 = arith.constant 0 : index
      %175 = vector.load %arg8[%c3_116, %c0_117, %c0_118] : memref<4x8x1xf32, #tpu.memory_space<vmem>>, vector<1x8x1xf32>
      %176 = vector.shape_cast %175 : vector<1x8x1xf32> to vector<8x1xf32>
      %177 = vector.shape_cast %174 : vector<8x1xf32> to vector<1x8x1xf32>
      tpu.vector_store %arg8[%c3_116, %c0_117, %c0_118], %177 {strides = array<i32>} : memref<4x8x1xf32, #tpu.memory_space<vmem>>, vector<1x8x1xf32>,
      %c3_119 = arith.constant 3 : index
      %c0_120 = arith.constant 0 : index
      %c0_121 = arith.constant 0 : index
      %178 = vector.load %arg9[%c3_119, %c0_120, %c0_121] : memref<4x8x8xf32, #tpu.memory_space<vmem>>, vector<1x8x8xf32>
      %179 = vector.shape_cast %178 : vector<1x8x8xf32> to vector<8x8xf32>
      %180 = vector.broadcast %165 : vector<8x1xf32> to vector<8x8xf32>
      %181 = arith.mulf %180, %179 : vector<8x8xf32>
      %182 = arith.truncf %168 : vector<8x8xf32> to vector<8x8xbf16>
      %cst_122 = arith.constant dense<0.000000e+00> : vector<8x8xf32>
      %183 = tpu.matmul %182, %153, %cst_122 {dimension_numbers = #tpu.dot_dimension_numbers<[1], [0], [0], [1], [0, 0, 1, 1], [], []>} : vector<8x8xbf16>, vector<8x8xbf16>, vector<8x8xf32> -> vector<8x8xf32>
      %184 = arith.addf %181, %183 : vector<8x8xf32>
      %c3_123 = arith.constant 3 : index
      %c0_124 = arith.constant 0 : index
      %c0_125 = arith.constant 0 : index
      %185 = vector.load %arg9[%c3_123, %c0_124, %c0_125] : memref<4x8x8xf32, #tpu.memory_space<vmem>>, vector<1x8x8xf32>
      %186 = vector.shape_cast %185 : vector<1x8x8xf32> to vector<8x8xf32>
      %187 = vector.shape_cast %184 : vector<8x8xf32> to vector<1x8x8xf32>
      tpu.vector_store %arg9[%c3_123, %c0_124, %c0_125], %187 {strides = array<i32>} : memref<4x8x8xf32, #tpu.memory_space<vmem>>, vector<1x8x8xf32>,
      %c3_126 = arith.constant 3 : index
      %c0_127 = arith.constant 0 : index
      %c0_128 = arith.constant 0 : index
      %188 = vector.load %arg7[%c3_126, %c0_127, %c0_128] : memref<4x8x1xf32, #tpu.memory_space<vmem>>, vector<1x8x1xf32>
      %189 = vector.shape_cast %188 : vector<1x8x1xf32> to vector<8x1xf32>
      %190 = vector.shape_cast %163 : vector<8x1xf32> to vector<1x8x1xf32>
      tpu.vector_store %arg7[%c3_126, %c0_127, %c0_128], %190 {strides = array<i32>} : memref<4x8x1xf32, #tpu.memory_space<vmem>>, vector<1x8x1xf32>,
    } else {
    }
    %c0_i32_3 = arith.constant 0 : i32
    %9 = arith.cmpi eq, %arg2, %c0_i32_3 : i32
    %10 = arith.extui %9 : i1 to i32
    %c0_i32_4 = arith.constant 0 : i32
    %11 = arith.cmpi ne, %10, %c0_i32_4 : i32
    scf.if %11 {
      %c0 = arith.constant 0 : index
      %c0_5 = arith.constant 0 : index
      %c0_6 = arith.constant 0 : index
      %12 = vector.load %arg9[%c0, %c0_5, %c0_6] : memref<4x8x8xf32, #tpu.memory_space<vmem>>, vector<1x8x8xf32>
      %13 = vector.shape_cast %12 : vector<1x8x8xf32> to vector<8x8xf32>
      %c0_7 = arith.constant 0 : index
      %c0_8 = arith.constant 0 : index
      %c0_9 = arith.constant 0 : index
      %14 = vector.load %arg8[%c0_7, %c0_8, %c0_9] : memref<4x8x1xf32, #tpu.memory_space<vmem>>, vector<1x8x1xf32>
      %15 = vector.shape_cast %14 : vector<1x8x1xf32> to vector<8x1xf32>
      %16 = tpu.reciprocal %15 {approx = true} : vector<8x1xf32> -> vector<8x1xf32>
      %17 = vector.broadcast %16 : vector<8x1xf32> to vector<8x8xf32>
      %18 = arith.mulf %13, %17 : vector<8x8xf32>
      %19 = arith.truncf %18 : vector<8x8xf32> to vector<8x8xbf16>
      %c0_10 = arith.constant 0 : index
      %c0_11 = arith.constant 0 : index
      %c0_12 = arith.constant 0 : index
      %20 = vector.load %arg6[%c0_10, %c0_11, %c0_12] : memref<1x8x32xbf16, #tpu.memory_space<vmem>>, vector<1x8x8xbf16>
      %21 = vector.shape_cast %20 : vector<1x8x8xbf16> to vector<8x8xbf16>
      %22 = vector.shape_cast %19 : vector<8x8xbf16> to vector<1x8x8xbf16>
      tpu.vector_store %arg6[%c0_10, %c0_11, %c0_12], %22 {strides = array<i32>} : memref<1x8x32xbf16, #tpu.memory_space<vmem>>, vector<1x8x8xbf16>,
      %c1 = arith.constant 1 : index
      %c0_13 = arith.constant 0 : index
      %c0_14 = arith.constant 0 : index
      %23 = vector.load %arg9[%c1, %c0_13, %c0_14] : memref<4x8x8xf32, #tpu.memory_space<vmem>>, vector<1x8x8xf32>
      %24 = vector.shape_cast %23 : vector<1x8x8xf32> to vector<8x8xf32>
      %c1_15 = arith.constant 1 : index
      %c0_16 = arith.constant 0 : index
      %c0_17 = arith.constant 0 : index
      %25 = vector.load %arg8[%c1_15, %c0_16, %c0_17] : memref<4x8x1xf32, #tpu.memory_space<vmem>>, vector<1x8x1xf32>
      %26 = vector.shape_cast %25 : vector<1x8x1xf32> to vector<8x1xf32>
      %27 = tpu.reciprocal %26 {approx = true} : vector<8x1xf32> -> vector<8x1xf32>
      %28 = vector.broadcast %27 : vector<8x1xf32> to vector<8x8xf32>
      %29 = arith.mulf %24, %28 : vector<8x8xf32>
      %30 = arith.truncf %29 : vector<8x8xf32> to vector<8x8xbf16>
      %c0_18 = arith.constant 0 : index
      %c0_19 = arith.constant 0 : index
      %c8 = arith.constant 8 : index
      %31 = vector.load %arg6[%c0_18, %c0_19, %c8] : memref<1x8x32xbf16, #tpu.memory_space<vmem>>, vector<1x8x8xbf16>
      %32 = vector.shape_cast %31 : vector<1x8x8xbf16> to vector<8x8xbf16>
      %33 = vector.shape_cast %30 : vector<8x8xbf16> to vector<1x8x8xbf16>
      tpu.vector_store %arg6[%c0_18, %c0_19, %c8], %33 {strides = array<i32>} : memref<1x8x32xbf16, #tpu.memory_space<vmem>>, vector<1x8x8xbf16>,
      %c2 = arith.constant 2 : index
      %c0_20 = arith.constant 0 : index
      %c0_21 = arith.constant 0 : index
      %34 = vector.load %arg9[%c2, %c0_20, %c0_21] : memref<4x8x8xf32, #tpu.memory_space<vmem>>, vector<1x8x8xf32>
      %35 = vector.shape_cast %34 : vector<1x8x8xf32> to vector<8x8xf32>
      %c2_22 = arith.constant 2 : index
      %c0_23 = arith.constant 0 : index
      %c0_24 = arith.constant 0 : index
      %36 = vector.load %arg8[%c2_22, %c0_23, %c0_24] : memref<4x8x1xf32, #tpu.memory_space<vmem>>, vector<1x8x1xf32>
      %37 = vector.shape_cast %36 : vector<1x8x1xf32> to vector<8x1xf32>
      %38 = tpu.reciprocal %37 {approx = true} : vector<8x1xf32> -> vector<8x1xf32>
      %39 = vector.broadcast %38 : vector<8x1xf32> to vector<8x8xf32>
      %40 = arith.mulf %35, %39 : vector<8x8xf32>
      %41 = arith.truncf %40 : vector<8x8xf32> to vector<8x8xbf16>
      %c0_25 = arith.constant 0 : index
      %c0_26 = arith.constant 0 : index
      %c16 = arith.constant 16 : index
      %42 = vector.load %arg6[%c0_25, %c0_26, %c16] : memref<1x8x32xbf16, #tpu.memory_space<vmem>>, vector<1x8x8xbf16>
      %43 = vector.shape_cast %42 : vector<1x8x8xbf16> to vector<8x8xbf16>
      %44 = vector.shape_cast %41 : vector<8x8xbf16> to vector<1x8x8xbf16>
      tpu.vector_store %arg6[%c0_25, %c0_26, %c16], %44 {strides = array<i32>} : memref<1x8x32xbf16, #tpu.memory_space<vmem>>, vector<1x8x8xbf16>,
      %c3 = arith.constant 3 : index
      %c0_27 = arith.constant 0 : index
      %c0_28 = arith.constant 0 : index
      %45 = vector.load %arg9[%c3, %c0_27, %c0_28] : memref<4x8x8xf32, #tpu.memory_space<vmem>>, vector<1x8x8xf32>
      %46 = vector.shape_cast %45 : vector<1x8x8xf32> to vector<8x8xf32>
      %c3_29 = arith.constant 3 : index
      %c0_30 = arith.constant 0 : index
      %c0_31 = arith.constant 0 : index
      %47 = vector.load %arg8[%c3_29, %c0_30, %c0_31] : memref<4x8x1xf32, #tpu.memory_space<vmem>>, vector<1x8x1xf32>
      %48 = vector.shape_cast %47 : vector<1x8x1xf32> to vector<8x1xf32>
      %49 = tpu.reciprocal %48 {approx = true} : vector<8x1xf32> -> vector<8x1xf32>
      %50 = vector.broadcast %49 : vector<8x1xf32> to vector<8x8xf32>
      %51 = arith.mulf %46, %50 : vector<8x8xf32>
      %52 = arith.truncf %51 : vector<8x8xf32> to vector<8x8xbf16>
      %c0_32 = arith.constant 0 : index
      %c0_33 = arith.constant 0 : index
      %c24 = arith.constant 24 : index
      %53 = vector.load %arg6[%c0_32, %c0_33, %c24] : memref<1x8x32xbf16, #tpu.memory_space<vmem>>, vector<1x8x8xbf16>
      %54 = vector.shape_cast %53 : vector<1x8x8xbf16> to vector<8x8xbf16>
      %55 = vector.shape_cast %52 : vector<8x8xbf16> to vector<1x8x8xbf16>
      tpu.vector_store %arg6[%c0_32, %c0_33, %c24], %55 {strides = array<i32>} : memref<1x8x32xbf16, #tpu.memory_space<vmem>>, vector<1x8x8xbf16>,
    } else {
    }
    return
  }
  func.func @transform_0(%arg0: i32, %arg1: i32, %arg2: i32) -> (i32, i32, i32) {
    %c0_i32 = arith.constant 0 : i32
    %c0_i32_0 = arith.constant 0 : i32
    return %arg0, %arg1, %c0_i32 : i32, i32, i32
  }
  func.func @transform_1(%arg0: i32, %arg1: i32, %arg2: i32) -> (i32, i32, i32) {
    %c0_i32 = arith.constant 0 : i32
    %c0_i32_0 = arith.constant 0 : i32
    return %arg0, %arg2, %c0_i32 : i32, i32, i32
  }
  func.func @transform_2(%arg0: i32, %arg1: i32, %arg2: i32) -> (i32, i32, i32) {
    %c0_i32 = arith.constant 0 : i32
    %c0_i32_0 = arith.constant 0 : i32
    return %arg0, %arg2, %c0_i32 : i32, i32, i32
  }
  func.func @transform_3(%arg0: i32, %arg1: i32, %arg2: i32) -> (i32, i32, i32) {
    %c0_i32 = arith.constant 0 : i32
    %c0_i32_0 = arith.constant 0 : i32
    return %arg0, %arg1, %c0_i32 : i32, i32, i32
  }
}

module attributes {stable_mosaic.version = 11 : i64} {
  func.func @kernel(%arg0: i32, %arg1: memref<16x32xf32, #tpu.memory_space<vmem>>, %arg2: memref<1x32xf32, #tpu.memory_space<vmem>>, %arg3: memref<1x32xf32, #tpu.memory_space<vmem>>, %arg4: memref<32x128xbf16, #tpu.memory_space<vmem>>, %arg5: memref<1x128xf32, #tpu.memory_space<vmem>>, %arg6: memref<128x32xbf16, #tpu.memory_space<vmem>>, %arg7: memref<1x32xf32, #tpu.memory_space<vmem>>, %arg8: memref<16x32xf32, #tpu.memory_space<vmem>>) attributes {dimension_semantics = [#tpu.dimension_semantics<parallel>], iteration_bounds = array<i64: 1>, scalar_prefetch = 0 : i64, scratch_operands = 0 : i64, tpu.core_type = #tpu.core_type<tc>, window_params = [{transform_indices = @transform_0, window_bounds = array<i64: 16, 32>}, {pipeline_mode = #tpu.pipeline_mode<synchronous>, transform_indices = @transform_1, window_bounds = array<i64: 1, 32>}, {pipeline_mode = #tpu.pipeline_mode<synchronous>, transform_indices = @transform_2, window_bounds = array<i64: 1, 32>}, {pipeline_mode = #tpu.pipeline_mode<synchronous>, transform_indices = @transform_3, window_bounds = array<i64: 32, 128>}, {pipeline_mode = #tpu.pipeline_mode<synchronous>, transform_indices = @transform_4, window_bounds = array<i64: 1, 128>}, {pipeline_mode = #tpu.pipeline_mode<synchronous>, transform_indices = @transform_5, window_bounds = array<i64: 128, 32>}, {pipeline_mode = #tpu.pipeline_mode<synchronous>, transform_indices = @transform_6, window_bounds = array<i64: 1, 32>}, {transform_indices = @transform_7, window_bounds = array<i64: 16, 32>}]} {
    %c0 = arith.constant 0 : index
    %c0_0 = arith.constant 0 : index
    %0 = vector.load %arg1[%c0, %c0_0] : memref<16x32xf32, #tpu.memory_space<vmem>>, vector<16x32xf32>
    %cst = arith.constant dense<0.000000e+00> : vector<16xf32>
    %1 = vector.multi_reduction <add>, %0, %cst [1] : vector<16x32xf32> to vector<16xf32>
    %2 = vector.shape_cast %1 : vector<16xf32> to vector<16x1xf32>
    %cst_1 = arith.constant 3.200000e+01 : f32
    %3 = vector.broadcast %cst_1 : f32 to vector<16x1xf32>
    %4 = arith.divf %2, %3 : vector<16x1xf32>
    %5 = vector.broadcast %4 : vector<16x1xf32> to vector<16x32xf32>
    %6 = arith.subf %0, %5 : vector<16x32xf32>
    %7 = arith.mulf %6, %6 : vector<16x32xf32>
    %cst_2 = arith.constant dense<0.000000e+00> : vector<16xf32>
    %8 = vector.multi_reduction <add>, %7, %cst_2 [1] : vector<16x32xf32> to vector<16xf32>
    %9 = vector.shape_cast %8 : vector<16xf32> to vector<16x1xf32>
    %cst_3 = arith.constant 3.200000e+01 : f32
    %10 = vector.broadcast %cst_3 : f32 to vector<16x1xf32>
    %11 = arith.divf %9, %10 : vector<16x1xf32>
    %12 = vector.broadcast %4 : vector<16x1xf32> to vector<16x32xf32>
    %13 = arith.subf %0, %12 : vector<16x32xf32>
    %cst_4 = arith.constant 9.99999974E-6 : f32
    %14 = vector.broadcast %cst_4 : f32 to vector<16x1xf32>
    %15 = arith.addf %11, %14 : vector<16x1xf32>
    %16 = math.rsqrt %15 : vector<16x1xf32>
    %17 = vector.broadcast %16 : vector<16x1xf32> to vector<16x32xf32>
    %18 = arith.mulf %13, %17 : vector<16x32xf32>
    %c0_5 = arith.constant 0 : index
    %c0_6 = arith.constant 0 : index
    %19 = vector.load %arg2[%c0_5, %c0_6] : memref<1x32xf32, #tpu.memory_space<vmem>>, vector<1x32xf32>
    %20 = vector.broadcast %19 : vector<1x32xf32> to vector<16x32xf32>
    %21 = arith.mulf %18, %20 : vector<16x32xf32>
    %c0_7 = arith.constant 0 : index
    %c0_8 = arith.constant 0 : index
    %22 = vector.load %arg3[%c0_7, %c0_8] : memref<1x32xf32, #tpu.memory_space<vmem>>, vector<1x32xf32>
    %23 = vector.broadcast %22 : vector<1x32xf32> to vector<16x32xf32>
    %24 = arith.addf %21, %23 : vector<16x32xf32>
    %25 = arith.truncf %24 : vector<16x32xf32> to vector<16x32xbf16>
    %c0_9 = arith.constant 0 : index
    %c0_10 = arith.constant 0 : index
    %26 = vector.load %arg4[%c0_9, %c0_10] : memref<32x128xbf16, #tpu.memory_space<vmem>>, vector<32x128xbf16>
    %cst_11 = arith.constant dense<0.000000e+00> : vector<16x128xf32>
    %27 = tpu.matmul %25, %26, %cst_11 {dimension_numbers = #tpu.dot_dimension_numbers<[1], [0], [0], [1], [0, 0, 1, 1], [], []>} : vector<16x32xbf16>, vector<32x128xbf16>, vector<16x128xf32> -> vector<16x128xf32>
    %c0_12 = arith.constant 0 : index
    %c0_13 = arith.constant 0 : index
    %28 = vector.load %arg5[%c0_12, %c0_13] : memref<1x128xf32, #tpu.memory_space<vmem>>, vector<1x128xf32>
    %29 = vector.broadcast %28 : vector<1x128xf32> to vector<16x128xf32>
    %30 = arith.addf %27, %29 : vector<16x128xf32>
    %cst_14 = arith.constant 0.000000e+00 : f32
    %31 = vector.broadcast %cst_14 : f32 to vector<16x128xf32>
    %32 = arith.maximumf %30, %31 : vector<16x128xf32>
    %33 = arith.truncf %32 : vector<16x128xf32> to vector<16x128xbf16>
    %c0_15 = arith.constant 0 : index
    %c0_16 = arith.constant 0 : index
    %34 = vector.load %arg6[%c0_15, %c0_16] : memref<128x32xbf16, #tpu.memory_space<vmem>>, vector<128x32xbf16>
    %cst_17 = arith.constant dense<0.000000e+00> : vector<16x32xf32>
    %35 = tpu.matmul %33, %34, %cst_17 {dimension_numbers = #tpu.dot_dimension_numbers<[1], [0], [0], [1], [0, 0, 1, 1], [], []>} : vector<16x128xbf16>, vector<128x32xbf16>, vector<16x32xf32> -> vector<16x32xf32>
    %c0_18 = arith.constant 0 : index
    %c0_19 = arith.constant 0 : index
    %36 = vector.load %arg7[%c0_18, %c0_19] : memref<1x32xf32, #tpu.memory_space<vmem>>, vector<1x32xf32>
    %37 = vector.broadcast %36 : vector<1x32xf32> to vector<16x32xf32>
    %38 = arith.addf %35, %37 : vector<16x32xf32>
    %39 = arith.addf %0, %38 : vector<16x32xf32>
    %c0_20 = arith.constant 0 : index
    %c0_21 = arith.constant 0 : index
    %40 = vector.load %arg8[%c0_20, %c0_21] : memref<16x32xf32, #tpu.memory_space<vmem>>, vector<16x32xf32>
    tpu.vector_store %arg8[%c0_20, %c0_21], %39 {strides = array<i32>} : memref<16x32xf32, #tpu.memory_space<vmem>>, vector<16x32xf32>,
    return
  }
  func.func @transform_0(%arg0: i32) -> (i32, i32) {
    %c0_i32 = arith.constant 0 : i32
    %c0_i32_0 = arith.constant 0 : i32
    return %arg0, %c0_i32 : i32, i32
  }
  func.func @transform_1(%arg0: i32) -> (i32, i32) {
    %c0_i32 = arith.constant 0 : i32
    %c0_i32_0 = arith.constant 0 : i32
    %c0_i32_1 = arith.constant 0 : i32
    return %c0_i32, %c0_i32_0 : i32, i32
  }
  func.func @transform_2(%arg0: i32) -> (i32, i32) {
    %c0_i32 = arith.constant 0 : i32
    %c0_i32_0 = arith.constant 0 : i32
    %c0_i32_1 = arith.constant 0 : i32
    return %c0_i32, %c0_i32_0 : i32, i32
  }
  func.func @transform_3(%arg0: i32) -> (i32, i32) {
    %c0_i32 = arith.constant 0 : i32
    %c0_i32_0 = arith.constant 0 : i32
    %c0_i32_1 = arith.constant 0 : i32
    return %c0_i32, %c0_i32_0 : i32, i32
  }
  func.func @transform_4(%arg0: i32) -> (i32, i32) {
    %c0_i32 = arith.constant 0 : i32
    %c0_i32_0 = arith.constant 0 : i32
    %c0_i32_1 = arith.constant 0 : i32
    return %c0_i32, %c0_i32_0 : i32, i32
  }
  func.func @transform_5(%arg0: i32) -> (i32, i32) {
    %c0_i32 = arith.constant 0 : i32
    %c0_i32_0 = arith.constant 0 : i32
    %c0_i32_1 = arith.constant 0 : i32
    return %c0_i32, %c0_i32_0 : i32, i32
  }
  func.func @transform_6(%arg0: i32) -> (i32, i32) {
    %c0_i32 = arith.constant 0 : i32
    %c0_i32_0 = arith.constant 0 : i32
    %c0_i32_1 = arith.constant 0 : i32
    return %c0_i32, %c0_i32_0 : i32, i32
  }
  func.func @transform_7(%arg0: i32) -> (i32, i32) {
    %c0_i32 = arith.constant 0 : i32
    %c0_i32_0 = arith.constant 0 : i32
    return %arg0, %c0_i32 : i32, i32
  }
}

module attributes {stable_mosaic.version = 11 : i64} {
  func.func @kernel(%arg0: i32, %arg1: i32, %arg2: memref<16x32xf32, #tpu.memory_space<vmem>>, %arg3: memref<64x32xbf16, #tpu.memory_space<vmem>>, %arg4: memref<1x32xf32, #tpu.memory_space<vmem>>, %arg5: memref<1x32xf32, #tpu.memory_space<vmem>>, %arg6: memref<16x64xf32, #tpu.memory_space<vmem>>) attributes {dimension_semantics = [#tpu.dimension_semantics<parallel>, #tpu.dimension_semantics<parallel>], iteration_bounds = array<i64: 1, 1>, scalar_prefetch = 0 : i64, scratch_operands = 0 : i64, tpu.core_type = #tpu.core_type<tc>, window_params = [{transform_indices = @transform_0, window_bounds = array<i64: 16, 32>}, {transform_indices = @transform_1, window_bounds = array<i64: 64, 32>}, {pipeline_mode = #tpu.pipeline_mode<synchronous>, transform_indices = @transform_2, window_bounds = array<i64: 1, 32>}, {pipeline_mode = #tpu.pipeline_mode<synchronous>, transform_indices = @transform_3, window_bounds = array<i64: 1, 32>}, {transform_indices = @transform_4, window_bounds = array<i64: 16, 64>}]} {
    %c0 = arith.constant 0 : index
    %c0_0 = arith.constant 0 : index
    %0 = vector.load %arg2[%c0, %c0_0] : memref<16x32xf32, #tpu.memory_space<vmem>>, vector<16x32xf32>
    %cst = arith.constant dense<0.000000e+00> : vector<16xf32>
    %1 = vector.multi_reduction <add>, %0, %cst [1] : vector<16x32xf32> to vector<16xf32>
    %2 = vector.shape_cast %1 : vector<16xf32> to vector<16x1xf32>
    %cst_1 = arith.constant 3.200000e+01 : f32
    %3 = vector.broadcast %cst_1 : f32 to vector<16x1xf32>
    %4 = arith.divf %2, %3 : vector<16x1xf32>
    %5 = vector.broadcast %4 : vector<16x1xf32> to vector<16x32xf32>
    %6 = arith.subf %0, %5 : vector<16x32xf32>
    %7 = arith.mulf %6, %6 : vector<16x32xf32>
    %cst_2 = arith.constant dense<0.000000e+00> : vector<16xf32>
    %8 = vector.multi_reduction <add>, %7, %cst_2 [1] : vector<16x32xf32> to vector<16xf32>
    %9 = vector.shape_cast %8 : vector<16xf32> to vector<16x1xf32>
    %cst_3 = arith.constant 3.200000e+01 : f32
    %10 = vector.broadcast %cst_3 : f32 to vector<16x1xf32>
    %11 = arith.divf %9, %10 : vector<16x1xf32>
    %12 = vector.broadcast %4 : vector<16x1xf32> to vector<16x32xf32>
    %13 = arith.subf %0, %12 : vector<16x32xf32>
    %cst_4 = arith.constant 9.99999974E-6 : f32
    %14 = vector.broadcast %cst_4 : f32 to vector<16x1xf32>
    %15 = arith.addf %11, %14 : vector<16x1xf32>
    %16 = math.rsqrt %15 : vector<16x1xf32>
    %17 = vector.broadcast %16 : vector<16x1xf32> to vector<16x32xf32>
    %18 = arith.mulf %13, %17 : vector<16x32xf32>
    %c0_5 = arith.constant 0 : index
    %c0_6 = arith.constant 0 : index
    %19 = vector.load %arg4[%c0_5, %c0_6] : memref<1x32xf32, #tpu.memory_space<vmem>>, vector<1x32xf32>
    %20 = vector.broadcast %19 : vector<1x32xf32> to vector<16x32xf32>
    %21 = arith.mulf %18, %20 : vector<16x32xf32>
    %c0_7 = arith.constant 0 : index
    %c0_8 = arith.constant 0 : index
    %22 = vector.load %arg5[%c0_7, %c0_8] : memref<1x32xf32, #tpu.memory_space<vmem>>, vector<1x32xf32>
    %23 = vector.broadcast %22 : vector<1x32xf32> to vector<16x32xf32>
    %24 = arith.addf %21, %23 : vector<16x32xf32>
    %25 = arith.truncf %24 : vector<16x32xf32> to vector<16x32xbf16>
    %c0_9 = arith.constant 0 : index
    %c0_10 = arith.constant 0 : index
    %26 = vector.load %arg3[%c0_9, %c0_10] : memref<64x32xbf16, #tpu.memory_space<vmem>>, vector<64x32xbf16>
    %cst_11 = arith.constant dense<0.000000e+00> : vector<16x64xf32>
    %27 = tpu.matmul %25, %26, %cst_11 {dimension_numbers = #tpu.dot_dimension_numbers<[1], [1], [0], [0], [0, 0, 1, 0], [], []>} : vector<16x32xbf16>, vector<64x32xbf16>, vector<16x64xf32> -> vector<16x64xf32>
    %c0_12 = arith.constant 0 : index
    %c0_13 = arith.constant 0 : index
    %28 = vector.load %arg6[%c0_12, %c0_13] : memref<16x64xf32, #tpu.memory_space<vmem>>, vector<16x64xf32>
    tpu.vector_store %arg6[%c0_12, %c0_13], %27 {strides = array<i32>} : memref<16x64xf32, #tpu.memory_space<vmem>>, vector<16x64xf32>,
    return
  }
  func.func @transform_0(%arg0: i32, %arg1: i32) -> (i32, i32) {
    %c0_i32 = arith.constant 0 : i32
    %c0_i32_0 = arith.constant 0 : i32
    return %arg0, %c0_i32 : i32, i32
  }
  func.func @transform_1(%arg0: i32, %arg1: i32) -> (i32, i32) {
    %c0_i32 = arith.constant 0 : i32
    %c0_i32_0 = arith.constant 0 : i32
    return %arg1, %c0_i32 : i32, i32
  }
  func.func @transform_2(%arg0: i32, %arg1: i32) -> (i32, i32) {
    %c0_i32 = arith.constant 0 : i32
    %c0_i32_0 = arith.constant 0 : i32
    %c0_i32_1 = arith.constant 0 : i32
    return %c0_i32, %c0_i32_0 : i32, i32
  }
  func.func @transform_3(%arg0: i32, %arg1: i32) -> (i32, i32) {
    %c0_i32 = arith.constant 0 : i32
    %c0_i32_0 = arith.constant 0 : i32
    %c0_i32_1 = arith.constant 0 : i32
    return %c0_i32, %c0_i32_0 : i32, i32
  }
  func.func @transform_4(%arg0: i32, %arg1: i32) -> (i32, i32) {
    %c0_i32 = arith.constant 0 : i32
    return %arg0, %arg1 : i32, i32
  }
}

</mosaic_0001>

<bundles_post_ra>
// kernel: gpt_forward.9
= control target key start
LH: loop header
LB: loop body
LE: loop exit
PB: predicated region body
PF: predicated region fallthrough
CT: control target
= control target key end

     0   :  { %vm23_vm0 = vcmask 261120   ;;  %v199_v15 = vmov 0.0   ;;  %vm200_vm1 = vmmov 0   ;;  %vm138_vm2 = vcmask 257024   ;;  %s201_s8 = smov 64   ;;  %s285_s0 = inlined_call_operand.vmem [shape: f32[16,32], index: 0, kind: input, shape index: {}]   ;;  %s286_s3 = inlined_call_operand.vmem [shape: bf16[32,96], index: 3, kind: input, shape index: {}]   ;;  %s287_s1 = inlined_call_operand.vmem [shape: f32[1,32], index: 1, kind: input, shape index: {}]   ;;  %s288_s2 = inlined_call_operand.vmem [shape: f32[1,32], index: 2, kind: input, shape index: {}]   ;;  %s289_s4 = inlined_call_operand.vmem [shape: bf16[16,32], index: 4, kind: output, shape index: {0}]   ;;  %s290_s6 = inlined_call_operand.vmem [shape: bf16[16,32], index: 6, kind: output, shape index: {2}]   ;;  %s291_s5 = inlined_call_operand.vmem [shape: bf16[16,32], index: 5, kind: output, shape index: {1}]  }
   0x1   :  { %v21_v0 = vld [vmem:[%s285_s0] sm:$0xff]  ;;  %v22_v1 = vld [vmem:[%s285_s0 + $0x8] sm:$0xff]  ;;  %181 = vmatprep.subr.bf16.mxu0 %v199_v15  ;;  %185 = vmatprep.mubr.msk.bf16.mxu0 %vm200_vm1, %v199_v15 }
   0x2   :  { %v24_v2 = vsel %vm23_vm0, %v21_v0, 0.0  ;;  %v27_v3 = vsel %vm23_vm0, %v22_v1, 0.0  ;;  %v193_v14 = vld [vmem:[%s286_s3] sm:$0xff]   ;;  %v194_v16 = vld [vmem:[%s286_s3 + $0x8] sm:$0xff]  }
   0x3   :  { %25 = vadd.xlane.f32.xlu0 %v24_v2  ;;  %182 = vmatpush3.bf16.msra.mxu0 %v193_v14  ;;  %v169_v25 = vld [vmem:[%s287_s1] ss:$0 sm:$0xff] }
   0x4   :  { %183 = vmatprep.subr.bf16.mxu0 %v199_v15  ;;  %v170_v29 = vld [vmem:[%s288_s2] ss:$0 sm:$0xff]  ;;  %s202_s2 = smov 96  }
   0x7   :  { %28 = vadd.xlane.f32.xlu0 %v27_v3  ;;  %184 = vmatpush3.bf16.msra.mxu0 %v194_v16 }
  0x90   :  { %v26_v4 = vpop.xlane.xlu0 %25 }
  0x91   :  { %v31_v5 = vmul.f32 0.03125, %v26_v4 }
  0x93   :  { %v33_v6 = vsub.f32 %v21_v0, %v31_v5 }
  0x94   :  { %v29_v7 = vpop.xlane.xlu0 %28 }
  0x95   :  { %v32_v8 = vmul.f32 0.03125, %v29_v7  ;;  %v35_v9 = vmul.f32 %v33_v6, %v33_v6 }
  0x97   :  { %v34_v10 = vsub.f32 %v22_v1, %v32_v8  ;;  %v37_v11 = vsel %vm23_vm0, %v35_v9, 0.0 }
  0x98   :  { %38 = vadd.xlane.f32.xlu1 %v37_v11 }
  0x99   :  { %v36_v12 = vmul.f32 %v34_v10, %v34_v10 }
  0x9b   :  { %v40_v13 = vsel %vm23_vm0, %v36_v12, 0.0 }
  0x9c   :  { %41 = vadd.xlane.f32.xlu1 %v40_v13 }
 0x125   :  { %v39_v17 = vpop.xlane.xlu1 %38 }
 0x126   :  { %v43_v18 = vmul.f32 0.03125, %v39_v17 }
 0x128   :  { %v45_v19 = vadd.f32 1e-05, %v43_v18 }
 0x129   :  { %v42_v20 = vpop.xlane.xlu1 %41 }
 0x12a   :  { %195 = vrsqrt.f32 %v45_v19  ;;  %v44_v21 = vmul.f32 0.03125, %v42_v20 }
 0x12c   :  { %v46_v22 = vadd.f32 1e-05, %v44_v21 }
 0x12e   :  { %197 = vrsqrt.f32 %v46_v22 }
 0x134   :  { %v196_v23 = vpop.eup %195 }
 0x135   :  { %v49_v24 = vmul.f32 %v196_v23, %v33_v6 }
 0x137   :  { %v58_v28 = vmul.f32 %v169_v25, %v49_v24 }
 0x138   :  { %v198_v26 = vpop.eup %197 }
 0x139   :  { %v50_v27 = vmul.f32 %v198_v26, %v34_v10  ;;  %v67_v31 = vadd.f32 %v170_v29, %v58_v28 }
 0x13b   :  { %v59_v30 = vmul.f32 %v169_v25, %v50_v27 }
 0x13d   :  { %v68_v32 = vadd.f32 %v170_v29, %v59_v30 }
 0x13f   :  { %v69_v33 = vpack.c.bf16 %v68_v32, %v67_v31 }
 0x141   :  { %186 = vmatmul.mubr.msk.bf16.vlgmr.msra.gmra.mrb[0].mxu0 %vm23_vm0, %v69_v33 }
 0x214   :  { %v123_v34 = vpop.f32.mrb[0].mxu0 }
 0x215   :  { %v176_v35 = vpack.c.bf16 %v123_v34, %v123_v34  ;;  %v187_v36 = vpop.f32.mrb[1].mxu0 }
 0x216   :  { %v126_v37 = vpop.f32.mrb[2].mxu0 }
 0x217   :  { %139 = vst.msk [vmem:[%s289_s4] sm:$0xf] %vm138_vm2, %v176_v35  ;;  %v177_v38 = vpack.c.bf16 %v126_v37, %v126_v37  ;;  %149 = vrot.lane.b32.xlu1 %v176_v35, %s201_s8  ;;  %141 = vrot.lane.b32.xlu0 %v176_v35, %s202_s2  ;;  %v188_v39 = vpop.f32.mrb[3].mxu0 }
 0x219   :  { %140 = vst.msk [vmem:[%s289_s4 + $0x4] sm:$0xf] %vm138_vm2, %v177_v38 }
 0x21b   :  { %143 = vrot.lane.b32.xlu1 %v177_v38, %s202_s2 }
 0x21f   :  { %151 = vrot.lane.b32.xlu1 %v177_v38, %s201_s8 }
 0x289   :  { %v150_v40 = vpop.permute.xlu1 %149  ;;  %v142_v41 = vpop.permute.xlu0 %141 }
 0x28a   :  { %155 = vst.msk [vmem:[%s290_s6] sm:$0xf] %vm138_vm2, %v150_v40  ;;  %147 = vst.msk [vmem:[%s291_s5] sm:$0xf] %vm138_vm2, %v142_v41 }
 0x28d   :  { %v144_v42 = vpop.permute.xlu1 %143 }
 0x28e   :  { %148 = vst.msk [vmem:[%s291_s5 + $0x4] sm:$0xf] %vm138_vm2, %v144_v42 }
 0x291   :  { %v152_v43 = vpop.permute.xlu1 %151 }
 0x292   :  { %156 = vst.msk [vmem:[%s290_s6 + $0x4] sm:$0xf] %vm138_vm2, %v152_v43 }

// kernel: gpt_forward.11
= control target key start
LH: loop header
LB: loop body
LE: loop exit
PB: predicated region body
PF: predicated region fallthrough
CT: control target
= control target key end

     0   :  { %v124_v0 = vmov 0.0   ;;  %vm125_vm0 = vmmov 0   ;;  %vm48_vm1 = vcmask 261120   ;;  %s178_s1 = inlined_call_operand.vmem [shape: bf16[32,32], index: 1, kind: input, shape index: {}]   ;;  %s179_s0 = inlined_call_operand.vmem [shape: bf16[16,32], index: 0, kind: input, shape index: {}]   ;;  %s180_s2 = inlined_call_operand.vmem [shape: f32[1,32], index: 2, kind: input, shape index: {}]   ;;  %s181_s3 = inlined_call_operand.vmem [shape: f32[16,32], index: 3, kind: input, shape index: {}]   ;;  %s182_s4 = inlined_call_operand.vmem [shape: f32[16,32], index: 4, kind: output, shape index: {}]  }
   0x1   :  { %111 = vmatprep.subr.bf16.mxu0 %v124_v0  ;;  %v121_v1 = vld [vmem:[%s178_s1] sm:$0xff]   ;;  %115 = vmatprep.mubr.msk.bf16.mxu0 %vm125_vm0, %v124_v0  ;;  %v122_v2 = vld [vmem:[%s178_s1 + $0x8] sm:$0xff]  }
   0x2   :  { %112 = vmatpush3.bf16.msra.mxu0 %v121_v1  ;;  %v123_v3 = vld [vmem:[%s179_s0] sm:$0xff]   ;;  %v94_v10 = vld [vmem:[%s181_s3 + $0x8] sm:$0xff] }
   0x3   :  { %113 = vmatprep.subr.bf16.mxu0 %v124_v0  ;;  %v103_v4 = vld [vmem:[%s180_s2] ss:$0 sm:$0xff] }
   0x4   :  { %v93_v6 = vld [vmem:[%s181_s3] sm:$0xff] }
   0x6   :  { %114 = vmatpush3.bf16.msra.mxu0 %v122_v2 }
   0x9   :  { %116 = vmatmul.mubr.msk.bf16.vlgmr.msra.gmra.mrb[0].mxu0 %vm48_vm1, %v123_v3 }
  0xdc   :  { %v86_v5 = vpop.f32.mrb[0].mxu0 }
  0xdd   :  { %v87_v7 = vadd.f32 %v103_v4, %v86_v5  ;;  %v117_v8 = vpop.f32.mrb[1].mxu0 }
  0xde   :  { %v89_v9 = vpop.f32.mrb[2].mxu0 }
  0xdf   :  { %v95_v11 = vadd.f32 %v93_v6, %v87_v7  ;;  %v90_v12 = vadd.f32 %v103_v4, %v89_v9  ;;  %v118_v13 = vpop.f32.mrb[3].mxu0 }
  0xe1   :  { %97 = vst.msk [vmem:[%s182_s4] sm:$0xff] %vm48_vm1, %v95_v11  ;;  %v96_v14 = vadd.f32 %v94_v10, %v90_v12 }
  0xe3   :  { %98 = vst.msk [vmem:[%s182_s4 + $0x8] sm:$0xff] %vm48_vm1, %v96_v14 }

// kernel: gpt_forward.12
= control target key start
LH: loop header
LB: loop body
LE: loop exit
PB: predicated region body
PF: predicated region fallthrough
CT: control target
= control target key end

     0   :  { %vm29_vm0 = vcmask 261120   ;;  %v337_v15 = vmov 0.0   ;;  %vm338_vm1 = vmmov 0   ;;  %s450_s0 = inlined_call_operand.vmem [shape: f32[16,32], index: 0, kind: input, shape index: {}]   ;;  %s451_s3 = inlined_call_operand.vmem [shape: bf16[32,128], index: 3, kind: input, shape index: {}]   ;;  %s452_s5 = inlined_call_operand.vmem [shape: bf16[128,32], index: 5, kind: input, shape index: {}]   ;;  %s453_s1 = inlined_call_operand.vmem [shape: f32[1,32], index: 1, kind: input, shape index: {}]   ;;  %s454_s2 = inlined_call_operand.vmem [shape: f32[1,32], index: 2, kind: input, shape index: {}]   ;;  %s455_s4 = inlined_call_operand.vmem [shape: f32[1,128], index: 4, kind: input, shape index: {}]   ;;  %s456_s6 = inlined_call_operand.vmem [shape: f32[1,32], index: 6, kind: input, shape index: {}]   ;;  %s457_s7 = inlined_call_operand.vmem [shape: f32[16,32], index: 7, kind: output, shape index: {}]  }
   0x1   :  { %v382_v0 = vld [vmem:[%s450_s0] sm:$0xff]  ;;  %v387_v1 = vld [vmem:[%s450_s0 + $0x8] sm:$0xff]  ;;  %293 = vmatprep.subr.bf16.mxu0 %v337_v15  ;;  %301 = vmatprep.subr.bf16.mxu1 %v337_v15  ;;  %v327_v19 = vld [vmem:[%s452_s5 + $0x10] sm:$0xff]  }
   0x2   :  { %v30_v2 = vsel %vm29_vm0, %v382_v0, 0.0  ;;  %v33_v3 = vsel %vm29_vm0, %v387_v1, 0.0  ;;  %v323_v14 = vld [vmem:[%s451_s3] sm:$0xff]   ;;  %v324_v16 = vld [vmem:[%s451_s3 + $0x8] sm:$0xff]   ;;  %297 = vmatprep.mubr.msk.bf16.mxu0 %vm338_vm1, %v337_v15  ;;  %317 = vmatprep.mubr.msk.bf16.mxu1 %vm338_vm1, %v337_v15  ;;  %v328_v20 = vld [vmem:[%s452_s5 + $0x18] sm:$0xff]  }
   0x3   :  { %31 = vadd.xlane.f32.xlu0 %v30_v2  ;;  %294 = vmatpush3.bf16.msra.mxu0 %v323_v14  ;;  %v325_v17 = vld [vmem:[%s452_s5] sm:$0xff]   ;;  %v326_v18 = vld [vmem:[%s452_s5 + $0x8] sm:$0xff]   ;;  %v331_v40 = vld [vmem:[%s452_s5 + $0x30] sm:$0xff]  }
   0x4   :  { %295 = vmatprep.subr.bf16.mxu0 %v337_v15  ;;  %302 = vmatpush3.bf16.msra.mxu1 %v325_v17  ;;  %v329_v21 = vld [vmem:[%s452_s5 + $0x20] sm:$0xff]   ;;  %v330_v22 = vld [vmem:[%s452_s5 + $0x28] sm:$0xff]   ;;  %v332_v41 = vld [vmem:[%s452_s5 + $0x38] sm:$0xff]  }
   0x5   :  { %303 = vmatprep.subr.bf16.mxu1 %v337_v15  ;;  %v266_v31 = vld [vmem:[%s453_s1] ss:$0 sm:$0xff] }
   0x6   :  { %v267_v35 = vld [vmem:[%s454_s2] ss:$0 sm:$0xff] }
   0x7   :  { %34 = vadd.xlane.f32.xlu0 %v33_v3  ;;  %296 = vmatpush3.bf16.msra.mxu0 %v324_v16  ;;  %v268_v42 = vld [vmem:[%s455_s4] ss:$0 sm:$0xff] }
   0x8   :  { %304 = vmatpush3.bf16.msra.mxu1 %v326_v18  ;;  %v272_v52 = vld [vmem:[%s456_s6] ss:$0 sm:$0xff] }
   0x9   :  { %305 = vmatprep.subr.bf16.mxu1 %v337_v15 }
   0xc   :  { %306 = vmatpush3.bf16.msra.mxu1 %v327_v19 }
   0xd   :  { %307 = vmatprep.subr.bf16.mxu1 %v337_v15 }
  0x10   :  { %308 = vmatpush3.bf16.msra.mxu1 %v328_v20 }
  0x11   :  { %309 = vmatprep.subr.bf16.mxu1 %v337_v15 }
  0x14   :  { %310 = vmatpush3.bf16.msra.mxu1 %v329_v21 }
  0x15   :  { %311 = vmatprep.subr.bf16.mxu1 %v337_v15 }
  0x18   :  { %312 = vmatpush3.bf16.msra.mxu1 %v330_v22 }
  0x19   :  { %313 = vmatprep.subr.bf16.mxu1 %v337_v15 }
  0x1c   :  { %314 = vmatpush3.bf16.msra.mxu1 %v331_v40 }
  0x1d   :  { %315 = vmatprep.subr.bf16.mxu1 %v337_v15 }
  0x20   :  { %316 = vmatpush3.bf16.msra.mxu1 %v332_v41 }
  0x90   :  { %v32_v4 = vpop.xlane.xlu0 %31 }
  0x91   :  { %v37_v5 = vmul.f32 0.03125, %v32_v4 }
  0x93   :  { %v39_v6 = vsub.f32 %v382_v0, %v37_v5 }
  0x94   :  { %v35_v7 = vpop.xlane.xlu0 %34 }
  0x95   :  { %v38_v8 = vmul.f32 0.03125, %v35_v7  ;;  %v41_v9 = vmul.f32 %v39_v6, %v39_v6 }
  0x97   :  { %v40_v10 = vsub.f32 %v387_v1, %v38_v8  ;;  %v43_v11 = vsel %vm29_vm0, %v41_v9, 0.0 }
  0x98   :  { %44 = vadd.xlane.f32.xlu1 %v43_v11 }
  0x99   :  { %v42_v12 = vmul.f32 %v40_v10, %v40_v10 }
  0x9b   :  { %v46_v13 = vsel %vm29_vm0, %v42_v12, 0.0 }
  0x9c   :  { %47 = vadd.xlane.f32.xlu1 %v46_v13 }
 0x125   :  { %v45_v23 = vpop.xlane.xlu1 %44 }
 0x126   :  { %v49_v24 = vmul.f32 0.03125, %v45_v23 }
 0x128   :  { %v51_v25 = vadd.f32 1e-05, %v49_v24 }
 0x129   :  { %v48_v26 = vpop.xlane.xlu1 %47 }
 0x12a   :  { %333 = vrsqrt.f32 %v51_v25  ;;  %v50_v27 = vmul.f32 0.03125, %v48_v26 }
 0x12c   :  { %v52_v28 = vadd.f32 1e-05, %v50_v27 }
 0x12e   :  { %335 = vrsqrt.f32 %v52_v28 }
 0x134   :  { %v334_v29 = vpop.eup %333 }
 0x135   :  { %v55_v30 = vmul.f32 %v334_v29, %v39_v6 }
 0x137   :  { %v64_v34 = vmul.f32 %v266_v31, %v55_v30 }
 0x138   :  { %v336_v32 = vpop.eup %335 }
 0x139   :  { %v56_v33 = vmul.f32 %v336_v32, %v40_v10  ;;  %v73_v37 = vadd.f32 %v267_v35, %v64_v34 }
 0x13b   :  { %v65_v36 = vmul.f32 %v266_v31, %v56_v33 }
 0x13d   :  { %v74_v38 = vadd.f32 %v267_v35, %v65_v36 }
 0x13f   :  { %v75_v39 = vpack.c.bf16 %v74_v38, %v73_v37 }
 0x141   :  { %298 = vmatmul.mubr.msk.bf16.vlgmr.msra.gmra.mrb[0].mxu0 %vm29_vm0, %v75_v39 }
 0x214   :  { %v136_v43 = vpop.f32.mrb[0].mxu0 }
 0x215   :  { %v137_v44 = vadd.f32 %v268_v42, %v136_v43  ;;  %v299_v45 = vpop.f32.mrb[1].mxu0 }
 0x216   :  { %v139_v46 = vpop.f32.mrb[2].mxu0 }
 0x217   :  { %v140_v47 = vadd.f32 %v268_v42, %v139_v46  ;;  %v300_v48 = vpop.f32.mrb[3].mxu0  ;;  %v143_v49 = vmax.f32 %v137_v44, 0.0 }
 0x219   :  { %v144_v50 = vmax.f32 %v140_v47, 0.0 }
 0x21b   :  { %v145_v51 = vpack.c.bf16 %v144_v50, %v143_v49 }
 0x21d   :  { %318 = vmatmul.mubr.bf16.vlgmr.msra.gmra.mrb[0].mxu1 %v145_v51 }
 0x2f0   :  { %v251_v53 = vpop.f32.mrb[0].mxu1 }
 0x2f1   :  { %v252_v54 = vadd.f32 %v272_v52, %v251_v53  ;;  %v319_v55 = vpop.f32.mrb[1].mxu1 }
 0x2f2   :  { %v254_v56 = vpop.f32.mrb[2].mxu1 }
 0x2f3   :  { %v258_v57 = vadd.f32 %v252_v54, %v382_v0  ;;  %v255_v58 = vadd.f32 %v272_v52, %v254_v56  ;;  %v320_v59 = vpop.f32.mrb[3].mxu1 }
 0x2f5   :  { %260 = vst.msk [vmem:[%s457_s7] sm:$0xff] %vm29_vm0, %v258_v57  ;;  %v259_v60 = vadd.f32 %v255_v58, %v387_v1 }
 0x2f7   :  { %261 = vst.msk [vmem:[%s457_s7 + $0x8] sm:$0xff] %vm29_vm0, %v259_v60 }

// kernel: gpt_forward.10
= control target key start
LH: loop header
LB: loop body
LE: loop exit
PB: predicated region body
PF: predicated region fallthrough
CT: control target
= control target key end

     0   :  { %s1279_s12 = smov 0   ;;  %s1281_s13 = smov 0   ;;  %s1488_s0 = inlined_call_operand.vmem [shape: bf16[2,8,32], index: 0, kind: input, shape index: {}]   ;;  %s1489_s1 = inlined_call_operand.vmem [shape: bf16[2,8,32], index: 1, kind: input, shape index: {}]   ;;  %s1490_s2 = inlined_call_operand.vmem [shape: bf16[2,8,32], index: 2, kind: input, shape index: {}]   ;;  %s1491_s3 = inlined_call_operand.vmem [shape: bf16[2,8,32], index: 3, kind: output, shape index: {}]  }
   0x1   :  { %s1283_s14 = smov 0  }
   0x2 LB: > { %s32_s15 = sadd.s32 1, %s1243_s13  ;;  %p1062_p0 = scmp.ge.s32.totalorder %s1247_s14, 1  ;;  %s1247_s14 = sphi %s1283_s14, %s13_s14   ;;  %s1243_s13 = sphi %s1281_s13, %s1493_s13   ;;  %s1239_s12 = sphi %s1279_s12, %s1492_s12  }
   0x3   : > { %p34_p1 = scmp.ge.s32.totalorder %s32_s15, 2  ;;  %p190_p2 = scmp.lt.s32.totalorder %s1247_s14, 3 }
   0x5   : > { %s1495_s15 = smov (%p34_p1, %s32_s15), 0  ;;  %p191_p3 = pnand %p1062_p0, %p190_p2 }
   0x6   : > { %p232_p4 = scmp.lt.s32.totalorder (!%p191_p3), %s1239_s12, 1  ;;  %vm276_vm0 = vcmask (!%p191_p3), 64512   ;;  %v1249_v0 = vmov (!%p191_p3), 0.0   ;;  %vm1250_vm1 = vmmov (!%p191_p3), 0   ;;  %vm267_vm2 = vcmask (!%p191_p3), 7168   ;;  %s1253_s23 = smov (!%p191_p3), 120  }
   0x7   : > { %194 = sbr.rel (%p191_p3) target bundleno = 1470 (0x5be), region = 32  ;;  %1108 = vmatprep.subr.bf16.mxu0 (!%p191_p3), %v1249_v0  ;;  %277 = vst.msk [vmem:[#allocation4] sm:$0xff] (!%p191_p3), %vm276_vm0, %v1249_v0  ;;  %278 = vst.msk [vmem:[#allocation4 + $0x8] sm:$0xff] (!%p191_p3), %vm276_vm0, %v1249_v0  ;;  %1110 = vmatprep.mubr.msk.bf16.mxu0 (!%p191_p3), %vm1250_vm1, %v1249_v0  ;;  %v1251_v4 = vmov (!%p191_p3), -1e+30   ;;  %v286_v5 = vlaneseq (!%p191_p3)  ;;  %v1252_v15 = vmov (!%p191_p3), 0  }
   0x8   : > { %279 = vst.msk [vmem:[#allocation4 + $0x10] sm:$0xff] (!%p191_p3), %vm276_vm0, %v1249_v0  ;;  %280 = vst.msk [vmem:[#allocation4 + $0x18] sm:$0xff] (!%p191_p3), %vm276_vm0, %v1249_v0  ;;  %1114 = vmatprep.subr.bf16.mxu1 (!%p191_p3), %v1249_v0  ;;  %1116 = vmatprep.mubr.msk.bf16.mxu1 (!%p191_p3), %vm1250_vm1, %v1249_v0  ;;  %s1254_s24 = smov (!%p191_p3), 112   ;;  %s1255_s25 = smov (!%p191_p3), 104   ;;  %vm382_vm4 = vcmask (!%p191_p3), 1043456   ;;  %vm889_vm5 = vcmask (!%p191_p3), 60416  }
   0x9   : > { %268 = vst.msk [vmem:[#allocation2] sm:$0xff] (!%p191_p3), %vm267_vm2, %v1251_v4  ;;  %269 = vst.msk [vmem:[#allocation2 + $0x8] sm:$0xff] (!%p191_p3), %vm267_vm2, %v1251_v4  ;;  %v1344_v6 = vshrl.u32 (!%p191_p3), %v286_v5, 7  ;;  %v1346_v7 = vand.u32 (!%p191_p3), 127, %v286_v5  ;;  %1190 = vset.pattern.permute.xlu0 (!%p191_p3), %v1252_v15  ;;  %1191 = vset.pattern.permute.xlu1 (!%p191_p3), %v1252_v15  ;;  %s1256_s5 = smov (!%p191_p3), 8   ;;  %s1257_s6 = smov (!%p191_p3), 16  }
   0xa   : > { %270 = vst.msk [vmem:[#allocation2 + $0x10] sm:$0xff] (!%p191_p3), %vm267_vm2, %v1251_v4  ;;  %271 = vst.msk [vmem:[#allocation2 + $0x18] sm:$0xff] (!%p191_p3), %vm267_vm2, %v1251_v4  ;;  %s1258_s7 = smov (!%p191_p3), 24   ;;  %vm909_vm6 = vcmask (!%p191_p3), 126016   ;;  %vm929_vm7 = vcmask (!%p191_p3), 191616   ;;  %vm949_vm8 = vcmask (!%p191_p3), 257216  }
   0xb   : > { %272 = vst.msk [vmem:[#allocation3] sm:$0xff] (!%p191_p3), %vm267_vm2, %v1249_v0  ;;  %273 = vst.msk [vmem:[#allocation3 + $0x8] sm:$0xff] (!%p191_p3), %vm267_vm2, %v1249_v0  ;;  %vm294_vm3 = vcmp.ge.s32.totalorder (!%p191_p3), %v1344_v6, %v1346_v7 }
   0xc   : > { %274 = vst.msk [vmem:[#allocation3 + $0x10] sm:$0xff] (!%p191_p3), %vm267_vm2, %v1249_v0  ;;  %275 = vst.msk [vmem:[#allocation3 + $0x18] sm:$0xff] (!%p191_p3), %vm267_vm2, %v1249_v0 }
   0xe   : > { %s1497_s12 = smov (!%p232_p4, %s1239_s12), 1 }
   0xf   : > { %s1311_s16 = sshll.u32 %s1497_s12, 2 }
  0x10   : > { %s1317_s19 = scalar_lea.vmem %s1489_s1, %s1311_s16  ;;  %s1324_s22 = scalar_lea.vmem %s1488_s0, %s1311_s16  ;;  %v1366_v22 = vld [vmem:[#allocation2] sm:$0xff]  ;;  %v1418_v4 = vld [vmem:[#allocation2 + $0x8] sm:$0xff] }
  0x11   : > { %v296_v1 = vld [vmem:[%s1317_s19] sm:$0xf]  ;;  %s1380_s28 = scalar_lea.vmem %s1490_s2, %s1311_s16  ;;  %v1428_v6 = vld [vmem:[#allocation2 + $0x10] sm:$0xff]  ;;  %s1470_s4 = scalar_lea.vmem %s1491_s3, %s1311_s16 }
  0x12   : > { %v303_v2 = vsel %vm276_vm0, %v296_v1, 0  ;;  %v295_v3 = vld [vmem:[%s1324_s22] sm:$0xf] }
  0x13   : > { %1109 = vmatpush3.bf16.xpose.msra.mxu0 %v303_v2  ;;  %v1192_v16 = vld [vmem:[%s1317_s19] ss:$0 sps:$4 sm:$0xff]  }
  0x14   : > { %1126 = vmatprep.subr.bf16.mxu0 %v1249_v0  ;;  %440 = vrot.lane.b32.xlu1 %v1192_v16, %s1253_s23  ;;  %v1193_v17 = vld [vmem:[%s1324_s22] ss:$0 sps:$4 sm:$0xff]  }
  0x15   : > { %v1194_v18 = vld [vmem:[%s1317_s19] ss:$0 sps:$4 sm:$0xff]  }
  0x16   : > { %v1195_v19 = vld [vmem:[%s1324_s22] ss:$0 sps:$4 sm:$0xff]  }
  0x17   : > { %v1196_v20 = vld [vmem:[%s1317_s19] ss:$0 sps:$4 sm:$0xff]  }
  0x18   : > { %435 = vrot.lane.b32.xlu1 %v1193_v17, %s1253_s23  ;;  %v1197_v21 = vld [vmem:[%s1324_s22] ss:$0 sps:$4 sm:$0xff]  }
  0x19   : > { %v297_v26 = vld [vmem:[%s1380_s28] sm:$0xf] }
  0x1a   : > { %1111 = vmatmul.mubr.msk.bf16.vlgmr.msra.gmra.mrb[0].mxu0 %vm276_vm0, %v295_v3  ;;  %v384_v27 = vsel %vm382_vm4, %v297_v26, 0  ;;  %v1198_v16 = vld [vmem:[%s1380_s28] ss:$0 sps:$4 sm:$0xff]  }
  0x1b   : > { %1128 = vmatprep.mubr.msk.bf16.mxu0 %vm1250_vm1, %v1249_v0  ;;  %1115 = vmatpush3.bf16.msra.mxu1 %v384_v27  ;;  %v1199_v17 = vld [vmem:[%s1380_s28] ss:$0 sps:$4 sm:$0xff]  }
  0x1c   : > { %589 = vrot.lane.b32.xlu1 %v1194_v18, %s1254_s24  ;;  %1120 = vmatprep.subr.bf16.mxu1 %v1249_v0  ;;  %v1200_v18 = vld [vmem:[%s1380_s28] ss:$0 sps:$4 sm:$0xff]  }
  0x20   : > { %584 = vrot.lane.b32.xlu1 %v1195_v19, %s1254_s24 }
  0x24   : > { %738 = vrot.lane.b32.xlu1 %v1196_v20, %s1255_s25 }
  0x28   : > { %733 = vrot.lane.b32.xlu1 %v1197_v21, %s1255_s25 }
  0x86   : > { %v441_v31 = vpop.permute.xlu1 %440 }
  0x87   : > { %v446_v34 = vsel %vm276_vm0, %v441_v31, 0 }
  0x8a   : > { %v436_v32 = vpop.permute.xlu1 %435 }
  0x8e   : > { %v590_v36 = vpop.permute.xlu1 %589 }
  0x8f   : > { %v595_v38 = vsel %vm276_vm0, %v590_v36, 0 }
  0x92   : > { %v585_v37 = vpop.permute.xlu1 %584 }
  0x96   : > { %v739_v39 = vpop.permute.xlu1 %738 }
  0x97   : > { %v744_v40 = vsel %vm276_vm0, %v739_v39, 0 }
  0x9a   : > { %v734_v41 = vpop.permute.xlu1 %733 }
  0xed   : > { %v339_v8 = vpop.f32.mrb[0].mxu0 }
  0xee   : > { %v345_v9 = vmul.f32 0.35355338, %v339_v8  ;;  %v1112_v10 = vpop.f32.mrb[1].mxu0 }
  0xef   : > { %v342_v11 = vpop.f32.mrb[2].mxu0 }
  0xf0   : > { %v1113_v12 = vpop.f32.mrb[3].mxu0  ;;  %v346_v13 = vsel %vm294_vm3, %v345_v9, -1e+30 }
  0xf1   : > { %v348_v14 = vsel %vm276_vm0, %v346_v13, -inf  ;;  %v789_v12 = vld [vmem:[#allocation2 + $0x18] sm:$0xff] }
  0xf2   : > { %349 = vmax.xlane.f32.xlu0 %v348_v14 }
 0x17f   : > { %v350_v23 = vpop.xlane.xlu0 %349 }
 0x180   : > { %v1369_v24 = vmax.f32 %v1366_v22, %v350_v23 }
 0x182   : > { %v352_v25 = vsub.f32 %v1366_v22, %v1369_v24  ;;  %428 = vst.msk [vmem:[#allocation2] sm:$0xff] %vm267_vm2, %v1369_v24  ;;  %357 = vperm.xlu0 %1190, %v1369_v24  }
 0x201   : > { %v358_v28 = vpop.permute.xlu0 %357 }
 0x202   : > { %v360_v29 = vsub.f32 %v346_v13, %v358_v28 }
 0x204   : > { %v361_v30 = vmul.f32 1.442695, %v360_v29 }
 0x206   : > { %1201 = vpow2.f32 %v361_v30 }
 0x210   : > { %v1385_v33 = vpop.eup %1201 }
 0x211   : > { %v378_v35 = vpack.c.bf16 %v1385_v33, %v1385_v33  ;;  %v365_v19 = vsel %vm276_vm0, %v1385_v33, 0.0 }
 0x213   : > { %1117 = vmatmul.mubr.msk.bf16.vlgmr.msra.gmra.mrb[0].mxu1 %vm276_vm0, %v378_v35 }
 0x214   : > { %1121 = vmatpush3.bf16.xpose.msra.mxu1 %v446_v34  ;;  %1122 = vmatprep.mubr.msk.bf16.mxu1 %vm1250_vm1, %v1249_v0 }
 0x215   : > { %1132 = vmatprep.subr.bf16.mxu1 %v1249_v0 }
 0x21b   : > { %1123 = vmatmul.mubr.msk.bf16.vlgmr.msra.gmra.mrb[4].mxu1 %vm276_vm0, %v436_v32 }
 0x21c   : > { %1133 = vmatpush3.bf16.xpose.msra.mxu1 %v595_v38  ;;  %1134 = vmatprep.mubr.msk.bf16.mxu1 %vm1250_vm1, %v1249_v0 }
 0x21d   : > { %1144 = vmatprep.subr.bf16.mxu1 %v1249_v0 }
 0x223   : > { %1135 = vmatmul.mubr.msk.bf16.vlgmr.msra.gmra.mrb[8].mxu1 %vm276_vm0, %v585_v37 }
 0x224   : > { %1145 = vmatpush3.bf16.xpose.msra.mxu1 %v744_v40  ;;  %1146 = vmatprep.mubr.msk.bf16.mxu1 %vm1250_vm1, %v1249_v0 }
 0x22b   : > { %1147 = vmatmul.mubr.msk.bf16.vlgmr.msra.gmra.mrb[12].mxu1 %vm276_vm0, %v734_v41 }
 0x2e6   : > { %v1404_v42 = vpop.f32.mrb[0].mxu1 }
 0x2e7   : > { %v1118_v43 = vpop.f32.mrb[1].mxu1 }
 0x2e8   : > { %v423_v44 = vpop.f32.mrb[2].mxu1 }
 0x2e9   : > { %v1119_v45 = vpop.f32.mrb[3].mxu1 }
 0x2ee   : > { %v482_v46 = vpop.f32.mrb[4].mxu1 }
 0x2ef   : > { %v488_v47 = vmul.f32 0.35355338, %v482_v46  ;;  %v1124_v48 = vpop.f32.mrb[5].mxu1  ;;  %v353_v46 = vmul.f32 1.442695, %v352_v25 }
 0x2f0   : > { %v485_v49 = vpop.f32.mrb[6].mxu1 }
 0x2f1   : > { %v1125_v50 = vpop.f32.mrb[7].mxu1  ;;  %v489_v51 = vsel %vm294_vm3, %v488_v47, -1e+30 }
 0x2f2   : > { %v492_v52 = vsel %vm276_vm0, %v489_v51, -inf }
 0x2f3   : > { %493 = vmax.xlane.f32.xlu1 %v492_v52 }
 0x2f6   : > { %v631_v53 = vpop.f32.mrb[8].mxu1 }
 0x2f7   : > { %v637_v54 = vmul.f32 0.35355338, %v631_v53  ;;  %v1136_v55 = vpop.f32.mrb[9].mxu1  ;;  %v363_v53 = vld [vmem:[#allocation3] sm:$0xff] }
 0x2f8   : > { %v634_v56 = vpop.f32.mrb[10].mxu1 }
 0x2f9   : > { %v1137_v57 = vpop.f32.mrb[11].mxu1  ;;  %v638_v58 = vsel %vm294_vm3, %v637_v54, -1e+30 }
 0x2fa   : > { %v641_v59 = vsel %vm276_vm0, %v638_v58, -inf }
 0x2fb   : > { %642 = vmax.xlane.f32.xlu0 %v641_v59 }
 0x2fe   : > { %v780_v60 = vpop.f32.mrb[12].mxu1 }
 0x2ff   : > { %v786_v61 = vmul.f32 0.35355338, %v780_v60  ;;  %v1148_v62 = vpop.f32.mrb[13].mxu1 }
 0x300   : > { %v783_v63 = vpop.f32.mrb[14].mxu1  ;;  %v657_v62 = vld [vmem:[#allocation3 + $0x10] sm:$0xff] }
 0x301   : > { %v1149_v1 = vpop.f32.mrb[15].mxu1  ;;  %v787_v2 = vsel %vm294_vm3, %v786_v61, -1e+30 }
 0x302   : > { %v790_v3 = vsel %vm276_vm0, %v787_v2, -inf }
 0x303   : > { %791 = vmax.xlane.f32.xlu1 %v790_v3 }
 0x380   : > { %v494_v5 = vpop.xlane.xlu1 %493 }
 0x381   : > { %v1421_v8 = vmax.f32 %v1418_v4, %v494_v5  ;;  %v371_v5 = vld [vmem:[#allocation4] sm:$0xff] }
 0x383   : > { %v496_v9 = vsub.f32 %v1418_v4, %v1421_v8  ;;  %577 = vst.msk [vmem:[#allocation2 + $0x8] sm:$0xff] %vm267_vm2, %v1421_v8  ;;  %501 = vperm.xlu1 %1191, %v1421_v8   ;;  %v806_v4 = vld [vmem:[#allocation3 + $0x18] sm:$0xff] }
 0x385   : > { %v497_v48 = vmul.f32 1.442695, %v496_v9 }
 0x388   : > { %v643_v7 = vpop.xlane.xlu0 %642 }
 0x389   : > { %v644_v10 = vmax.f32 %v1428_v6, %v643_v7 }
 0x38b   : > { %v645_v11 = vsub.f32 %v1428_v6, %v644_v10  ;;  %726 = vst.msk [vmem:[#allocation2 + $0x10] sm:$0xff] %vm267_vm2, %v644_v10  ;;  %650 = vperm.xlu0 %1190, %v644_v10  }
 0x38d   : > { %v646_v50 = vmul.f32 1.442695, %v645_v11 }
 0x390   : > { %v792_v13 = vpop.xlane.xlu1 %791 }
 0x391   : > { %v793_v14 = vmax.f32 %v789_v12, %v792_v13 }
 0x393   : > { %v794_v15 = vsub.f32 %v789_v12, %v793_v14  ;;  %875 = vst.msk [vmem:[#allocation2 + $0x18] sm:$0xff] %vm267_vm2, %v793_v14  ;;  %799 = vperm.xlu1 %1191, %v793_v14  }
 0x395   : > { %v795_v49 = vmul.f32 1.442695, %v794_v15 }
 0x397   : > { %527 = vrot.lane.b32.xlu1 %v1198_v16, %s1253_s23 }
 0x39b   : > { %676 = vrot.lane.b32.xlu1 %v1199_v17, %s1254_s24 }
 0x39f   : > { %825 = vrot.lane.b32.xlu1 %v1200_v18, %s1255_s25 }
 0x3c3   : > { %366 = vadd.xlane.f32.xlu1 %v365_v19 }
 0x402   : > { %v502_v20 = vpop.permute.xlu1 %501 }
 0x403   : > { %v504_v21 = vsub.f32 %v489_v51, %v502_v20 }
 0x405   : > { %v505_v23 = vmul.f32 1.442695, %v504_v21 }
 0x407   : > { %1203 = vpow2.f32 %v505_v23  ;;  %v516_v23 = vld [vmem:[#allocation4 + $0x8] sm:$0xff] }
 0x40a   : > { %v651_v26 = vpop.permute.xlu0 %650 }
 0x40b   : > { %v653_v27 = vsub.f32 %v638_v58, %v651_v26  ;;  %v508_v58 = vld [vmem:[#allocation3 + $0x8] sm:$0xff] }
 0x40d   : > { %v654_v28 = vmul.f32 1.442695, %v653_v27 }
 0x40f   : > { %1205 = vpow2.f32 %v654_v28 }
 0x411   : > { %v1204_v29 = vpop.eup %1203 }
 0x412   : > { %v800_v30 = vpop.permute.xlu1 %799  ;;  %v510_v31 = vsel %vm276_vm0, %v1204_v29, 0.0  ;;  %v523_v37 = vpack.c.bf16 %v1204_v29, %v1204_v29 }
 0x413   : > { %v802_v32 = vsub.f32 %v787_v2, %v800_v30  ;;  %511 = vadd.xlane.f32.xlu0 %v510_v31 }
 0x415   : > { %v803_v34 = vmul.f32 1.442695, %v802_v32  ;;  %v665_v32 = vld [vmem:[#allocation4 + $0x10] sm:$0xff] }
 0x416   : > { %v528_v35 = vpop.permute.xlu1 %527 }
 0x417   : > { %1207 = vpow2.f32 %v803_v34  ;;  %v533_v33 = vsel %vm382_vm4, %v528_v35, 0 }
 0x418   : > { %1127 = vmatpush3.bf16.msra.mxu0 %v533_v33  ;;  %1209 = vpow2.f32 %v353_v46 }
 0x419   : > { %v1206_v36 = vpop.eup %1205  ;;  %1138 = vmatprep.subr.bf16.mxu0 %v1249_v0  ;;  %1211 = vpow2.f32 %v497_v48 }
 0x41a   : > { %v659_v38 = vsel %vm276_vm0, %v1206_v36, 0.0  ;;  %v677_v39 = vpop.permute.xlu1 %676  ;;  %v672_v44 = vpack.c.bf16 %v1206_v36, %v1206_v36  ;;  %1213 = vpow2.f32 %v795_v49 }
 0x41b   : > { %660 = vadd.xlane.f32.xlu0 %v659_v38  ;;  %1129 = vmatmul.mubr.msk.bf16.vlgmr.msra.gmra.mrb[4].mxu0 %vm276_vm0, %v523_v37  ;;  %v682_v40 = vsel %vm382_vm4, %v677_v39, 0  ;;  %1215 = vpow2.f32 %v646_v50  ;;  %v814_v39 = vld [vmem:[#allocation4 + $0x18] sm:$0xff] }
 0x41c   : > { %1139 = vmatpush3.bf16.msra.mxu0 %v682_v40  ;;  %1140 = vmatprep.mubr.msk.bf16.mxu0 %vm1250_vm1, %v1249_v0 }
 0x41d   : > { %1150 = vmatprep.subr.bf16.mxu0 %v1249_v0 }
 0x41e   : > { %v826_v41 = vpop.permute.xlu1 %825 }
 0x41f   : > { %v831_v45 = vsel %vm382_vm4, %v826_v41, 0 }
 0x421   : > { %v1208_v43 = vpop.eup %1207 }
 0x422   : > { %v808_v47 = vsel %vm276_vm0, %v1208_v43, 0.0  ;;  %v821_v51 = vpack.c.bf16 %v1208_v43, %v1208_v43  ;;  %v1210_v22 = vpop.eup %1209 }
 0x423   : > { %1141 = vmatmul.mubr.msk.bf16.vlgmr.msra.gmra.mrb[8].mxu0 %vm276_vm0, %v672_v44  ;;  %809 = vadd.xlane.f32.xlu1 %v808_v47  ;;  %v1212_v24 = vpop.eup %1211 }
 0x424   : > { %1151 = vmatpush3.bf16.msra.mxu0 %v831_v45  ;;  %1152 = vmatprep.mubr.msk.bf16.mxu0 %vm1250_vm1, %v1249_v0  ;;  %v1214_v25 = vpop.eup %1213  ;;  %v364_v0 = vmul.f32 %v1210_v22, %v363_v53  ;;  %v509_v59 = vmul.f32 %v1212_v24, %v508_v58 }
 0x425   : > { %v1216_v52 = vpop.eup %1215  ;;  %v807_v8 = vmul.f32 %v1214_v25, %v806_v4 }
 0x426   : > { %v658_v63 = vmul.f32 %v1216_v52, %v657_v62 }
 0x42b   : > { %1153 = vmatmul.mubr.msk.bf16.vlgmr.msra.gmra.mrb[12].mxu0 %vm276_vm0, %v821_v51 }
 0x431   : > { %374 = vperm.xlu0 %1190, %v1210_v22  }
 0x434   : > { %519 = vperm.xlu1 %1191, %v1212_v24  }
 0x435   : > { %817 = vperm.xlu0 %1190, %v1214_v25  }
 0x438   : > { %668 = vperm.xlu1 %1191, %v1216_v52  }
 0x450   : > { %v367_v54 = vpop.xlane.xlu1 %366 }
 0x451   : > { %v368_v55 = vadd.f32 %v367_v54, %v364_v0 }
 0x453   : > { %370 = vst.msk [vmem:[#allocation3] sm:$0xff] %vm267_vm2, %v368_v55 }
 0x45a   : > { %v880_v56 = vld [vmem:[#allocation3] sm:$0xff] }
 0x45b   : > { %1217 = vrcp.f32 %v880_v56 }
 0x465   : > { %v1218_v57 = vpop.eup %1217 }
 0x466   : > { %884 = vperm.xlu1 %1191, %v1218_v57  }
 0x4a0   : > { %v512_v60 = vpop.xlane.xlu0 %511 }
 0x4a1   : > { %v513_v61 = vadd.f32 %v512_v60, %v509_v59 }
 0x4a3   : > { %514 = vst.msk [vmem:[#allocation3 + $0x8] sm:$0xff] %vm267_vm2, %v513_v61 }
 0x4a8   : > { %v661_v1 = vpop.xlane.xlu0 %660 }
 0x4a9   : > { %v662_v2 = vadd.f32 %v661_v1, %v658_v63 }
 0x4aa   : > { %v894_v3 = vld [vmem:[#allocation3 + $0x8] sm:$0xff] }
 0x4ab   : > { %663 = vst.msk [vmem:[#allocation3 + $0x10] sm:$0xff] %vm267_vm2, %v662_v2  ;;  %1219 = vrcp.f32 %v894_v3 }
 0x4b0   : > { %v810_v9 = vpop.xlane.xlu1 %809  ;;  %v375_v6 = vpop.permute.xlu0 %374 }
 0x4b1   : > { %v811_v7 = vadd.f32 %v810_v9, %v807_v8  ;;  %v377_v10 = vmul.f32 %v375_v6, %v371_v5 }
 0x4b2   : > { %v914_v11 = vld [vmem:[#allocation3 + $0x10] sm:$0xff] }
 0x4b3   : > { %812 = vst.msk [vmem:[#allocation3 + $0x18] sm:$0xff] %vm267_vm2, %v811_v7  ;;  %v426_v12 = vadd.f32 %v1404_v42, %v377_v10  ;;  %1221 = vrcp.f32 %v914_v11 }
 0x4b4   : > { %v520_v17 = vpop.permute.xlu1 %519  ;;  %v818_v40 = vpop.permute.xlu0 %817 }
 0x4b5   : > { %v1220_v13 = vpop.eup %1219  ;;  %427 = vst.msk [vmem:[#allocation4] sm:$0xff] %vm276_vm0, %v426_v12  ;;  %v522_v26 = vmul.f32 %v520_v17, %v516_v23  ;;  %v820_v41 = vmul.f32 %v818_v40, %v814_v39 }
 0x4b6   : > { %898 = vperm.xlu0 %1190, %v1220_v13  }
 0x4b8   : > { %v669_v18 = vpop.permute.xlu1 %668 }
 0x4b9   : > { %v671_v34 = vmul.f32 %v669_v18, %v665_v32 }
 0x4ba   : > { %v934_v14 = vld [vmem:[#allocation3 + $0x18] sm:$0xff] }
 0x4bb   : > { %1223 = vrcp.f32 %v934_v14 }
 0x4bc   : > { %v879_v19 = vld [vmem:[#allocation4] sm:$0xff] }
 0x4bd   : > { %v1222_v15 = vpop.eup %1221 }
 0x4be   : > { %918 = vperm.xlu0 %1190, %v1222_v15  }
 0x4c5   : > { %v1224_v16 = vpop.eup %1223 }
 0x4c6   : > { %938 = vperm.xlu0 %1190, %v1224_v16  }
 0x4e5   : > { %v885_v20 = vpop.permute.xlu1 %884 }
 0x4e6   : > { %v887_v21 = vmul.f32 %v885_v20, %v879_v19 }
 0x4e8   : > { %v888_v42 = vpack.c.bf16 %v887_v21, %v887_v21 }
 0x4ea   : > { %890 = vst.msk [vmem:[%s1470_s4] sm:$0xf] %vm889_vm5, %v888_v42 }
 0x4ee   : > { %v569_v27 = vpop.f32.mrb[4].mxu0 }
 0x4ef   : > { %v575_v28 = vadd.f32 %v569_v27, %v522_v26  ;;  %v1130_v29 = vpop.f32.mrb[5].mxu0 }
 0x4f0   : > { %v572_v30 = vpop.f32.mrb[6].mxu0 }
 0x4f1   : > { %576 = vst.msk [vmem:[#allocation4 + $0x8] sm:$0xff] %vm276_vm0, %v575_v28  ;;  %v1131_v31 = vpop.f32.mrb[7].mxu0 }
 0x4f6   : > { %v718_v35 = vpop.f32.mrb[8].mxu0 }
 0x4f7   : > { %v724_v33 = vadd.f32 %v718_v35, %v671_v34  ;;  %v1142_v36 = vpop.f32.mrb[9].mxu0 }
 0x4f8   : > { %v721_v37 = vpop.f32.mrb[10].mxu0  ;;  %v892_v49 = vld [vmem:[#allocation4 + $0x8] sm:$0xff] }
 0x4f9   : > { %725 = vst.msk [vmem:[#allocation4 + $0x10] sm:$0xff] %vm276_vm0, %v724_v33  ;;  %v1143_v38 = vpop.f32.mrb[11].mxu0 }
 0x4fe   : > { %v867_v43 = vpop.f32.mrb[12].mxu0 }
 0x4ff   : > { %v873_v44 = vadd.f32 %v867_v43, %v820_v41  ;;  %v1154_v45 = vpop.f32.mrb[13].mxu0 }
 0x500   : > { %v870_v46 = vpop.f32.mrb[14].mxu0  ;;  %v912_v24 = vld [vmem:[#allocation4 + $0x10] sm:$0xff] }
 0x501   : > { %874 = vst.msk [vmem:[#allocation4 + $0x18] sm:$0xff] %vm276_vm0, %v873_v44  ;;  %v1155_v47 = vpop.f32.mrb[15].mxu0 }
 0x508   : > { %v932_v0 = vld [vmem:[#allocation4 + $0x18] sm:$0xff] }
 0x535   : > { %v899_v48 = vpop.permute.xlu0 %898 }
 0x536   : > { %v901_v50 = vmul.f32 %v899_v48, %v892_v49 }
 0x538   : > { %v1089_v51 = vpack.c.bf16 %v901_v50, %v901_v50 }
 0x53a   : > { %906 = vrot.lane.b32.xlu1 %v1089_v51, %s1256_s5 }
 0x53d   : > { %v919_v22 = vpop.permute.xlu0 %918 }
 0x53e   : > { %v921_v25 = vmul.f32 %v919_v22, %v912_v24 }
 0x540   : > { %v1090_v52 = vpack.c.bf16 %v921_v25, %v921_v25 }
 0x542   : > { %926 = vrot.lane.b32.xlu1 %v1090_v52, %s1257_s6 }
 0x545   : > { %v939_v53 = vpop.permute.xlu0 %938 }
 0x546   : > { %v941_v54 = vmul.f32 %v939_v53, %v932_v0 }
 0x548   : > { %v1091_v55 = vpack.c.bf16 %v941_v54, %v941_v54 }
 0x54a   : > { %946 = vrot.lane.b32.xlu1 %v1091_v55, %s1258_s7 }
 0x5ac   : > { %v907_v56 = vpop.permute.xlu1 %906 }
 0x5ad   : > { %910 = vst.msk [vmem:[%s1470_s4] sm:$0xf] %vm909_vm6, %v907_v56 }
 0x5b4   : > { %v927_v57 = vpop.permute.xlu1 %926 }
 0x5b5   : > { %930 = vst.msk [vmem:[%s1470_s4] sm:$0xf] %vm929_vm7, %v927_v57 }
 0x5bc   : > { %v947_v58 = vpop.permute.xlu1 %946 }
 0x5bd   : > { %950 = vst.msk [vmem:[%s1470_s4] sm:$0xf] %vm949_vm8, %v947_v58 }
 0x5be PF: > { %s13_s14 = sadd.s32 1, %s1247_s14   ;;  %s1492_s12 = smov %s1243_s13 }
 0x5bf   : > { %p10_p5 = scmp.ge.s32.totalorder %s13_s14, 4   ;;  %s1493_s13 = smov %s1495_s15 }
 0x5c1   :  { %12 = sbr.rel (!%p10_p5) target bundleno = 2 (0x2), region = 95 }

// kernel: gpt_forward.17
= control target key start
LH: loop header
LB: loop body
LE: loop exit
PB: predicated region body
PF: predicated region fallthrough
CT: control target
= control target key end

     0   :  { %vm21_vm0 = vcmask 261120   ;;  %s307_s0 = inlined_call_operand.vmem [shape: f32[16,32], index: 0, kind: input, shape index: {}]   ;;  %s308_s1 = inlined_call_operand.vmem [shape: bf16[64,32], index: 1, kind: input, shape index: {}]   ;;  %s309_s2 = inlined_call_operand.vmem [shape: f32[1,32], index: 2, kind: input, shape index: {}]   ;;  %s310_s3 = inlined_call_operand.vmem [shape: f32[1,32], index: 3, kind: input, shape index: {}]   ;;  %s311_s4 = inlined_call_operand.hbm [shape: f32[16,64], index: 4, kind: output, shape index: {}]  }
   0x1   :  { %v19_v0 = vld [vmem:[%s307_s0] sm:$0xff]  ;;  %v20_v1 = vld [vmem:[%s307_s0 + $0x8] sm:$0xff] }
   0x2   :  { %v22_v2 = vsel %vm21_vm0, %v19_v0, 0.0  ;;  %v25_v3 = vsel %vm21_vm0, %v20_v1, 0.0 }
   0x3   :  { %23 = vadd.xlane.f32.xlu0 %v22_v2 }
   0x4   :  { %9 = vsyncpa [#allocation3], 0  ;;  %v200_v4 = vld [vmem:[%s308_s1] sm:$0xff]   ;;  %v232_v5 = vmov 0.0   ;;  %v201_v17 = vld [vmem:[%s308_s1 + $0x8] sm:$0xff]   ;;  %vm233_vm1 = vmmov 0  }
   0x5   :  { %183 = vmatprep.subr.bf16.mxu0 %v232_v5  ;;  %v100_v6 = vsel %vm21_vm0, %v200_v4, 0  ;;  %v103_v18 = vsel %vm21_vm0, %v201_v17, 0  ;;  %v202_v19 = vld [vmem:[%s308_s1 + $0x10] sm:$0xff]   ;;  %v203_v21 = vld [vmem:[%s308_s1 + $0x18] sm:$0xff]   ;;  %191 = vmatprep.mubr.msk.bf16.mxu0 %vm233_vm1, %v232_v5  ;;  %v171_v31 = vld [vmem:[%s309_s2] ss:$0 sm:$0xff] }
   0x6   :  { %184 = vmatpush3.bf16.xpose.msra.mxu0 %v100_v6  ;;  %v106_v20 = vsel %vm21_vm0, %v202_v19, 0  ;;  %v109_v22 = vsel %vm21_vm0, %v203_v21, 0  ;;  %v172_v35 = vld [vmem:[%s310_s3] ss:$0 sm:$0xff]  ;;  %s234_s29 = smov [#allocation2]   ;;  %vm152_vm2 = vcmask 523264  }
   0x7   :  { %26 = vadd.xlane.f32.xlu0 %v25_v3  ;;  %185 = vmatprep.subr.bf16.mxu0 %v232_v5  ;;  %s160_s30 = sshll.u32 %s234_s29, 4  ;;  %s161_s30 = int_to_ptr.vmem [resolvable:$true] %s160_s30 }
   0x8   :  { %s208_s2 = scalar_lea.vmem %s161_s30, 256  ;;  %p213_p1 = scmp.lt.s32.totalorder %s161_s30, %s161_s30 }
   0x9   :  { %p209_p0 = scmp.ne.s32.totalorder %s161_s30, %s208_s2  ;;  %p214_p2 = scmp.lt.s32.totalorder %s208_s2, %s208_s2 }
   0xb   :  { %p215_p3 = por %p214_p2, %p213_p1 }
   0xd   :  { %p216_p4 = pnand %p215_p3, %p209_p0 }
   0xe   :  { %186 = vmatpush3.bf16.xpose.msra.mxu0 %v103_v18 }
   0xf   :  { %187 = vmatprep.subr.bf16.mxu0 %v232_v5 }
  0x16   :  { %188 = vmatpush3.bf16.xpose.msra.mxu0 %v106_v20 }
  0x17   :  { %189 = vmatprep.subr.bf16.mxu0 %v232_v5 }
  0x1e   :  { %190 = vmatpush3.bf16.xpose.msra.mxu0 %v109_v22 }
  0x90   :  { %v24_v7 = vpop.xlane.xlu0 %23 }
  0x91   :  { %v29_v8 = vmul.f32 0.03125, %v24_v7 }
  0x93   :  { %v31_v9 = vsub.f32 %v19_v0, %v29_v8 }
  0x94   :  { %v27_v10 = vpop.xlane.xlu0 %26 }
  0x95   :  { %v30_v11 = vmul.f32 0.03125, %v27_v10  ;;  %v33_v12 = vmul.f32 %v31_v9, %v31_v9 }
  0x97   :  { %v32_v13 = vsub.f32 %v20_v1, %v30_v11  ;;  %v35_v14 = vsel %vm21_vm0, %v33_v12, 0.0 }
  0x98   :  { %36 = vadd.xlane.f32.xlu1 %v35_v14 }
  0x99   :  { %v34_v15 = vmul.f32 %v32_v13, %v32_v13 }
  0x9b   :  { %v38_v16 = vsel %vm21_vm0, %v34_v15, 0.0 }
  0x9c   :  { %39 = vadd.xlane.f32.xlu1 %v38_v16 }
 0x125   :  { %v37_v23 = vpop.xlane.xlu1 %36 }
 0x126   :  { %v41_v24 = vmul.f32 0.03125, %v37_v23 }
 0x128   :  { %v43_v25 = vadd.f32 1e-05, %v41_v24 }
 0x129   :  { %v40_v26 = vpop.xlane.xlu1 %39 }
 0x12a   :  { %204 = vrsqrt.f32 %v43_v25  ;;  %v42_v27 = vmul.f32 0.03125, %v40_v26 }
 0x12c   :  { %v44_v28 = vadd.f32 1e-05, %v42_v27 }
 0x12e   :  { %206 = vrsqrt.f32 %v44_v28 }
 0x134   :  { %v205_v29 = vpop.eup %204 }
 0x135   :  { %v47_v30 = vmul.f32 %v205_v29, %v31_v9 }
 0x137   :  { %v56_v34 = vmul.f32 %v171_v31, %v47_v30 }
 0x138   :  { %v207_v32 = vpop.eup %206 }
 0x139   :  { %v48_v33 = vmul.f32 %v207_v32, %v32_v13  ;;  %v65_v37 = vadd.f32 %v172_v35, %v56_v34 }
 0x13b   :  { %v57_v36 = vmul.f32 %v171_v31, %v48_v33 }
 0x13d   :  { %v66_v38 = vadd.f32 %v172_v35, %v57_v36 }
 0x13f   :  { %v67_v39 = vpack.c.bf16 %v66_v38, %v65_v37 }
 0x141   :  { %192 = vmatmul.mubr.msk.bf16.vlgmr.msra.gmra.mrb[0].mxu0 %vm21_vm0, %v67_v39 }
 0x214   :  { %v145_v40 = vpop.f32.mrb[0].mxu0 }
 0x215   :  { %153 = vst.msk [vmem:[#allocation2] sm:$0xff] %vm152_vm2, %v145_v40  ;;  %v193_v41 = vpop.f32.mrb[1].mxu0 }
 0x216   :  { %v148_v42 = vpop.f32.mrb[2].mxu0 }
 0x217   :  { %154 = vst.msk [vmem:[#allocation2 + $0x8] sm:$0xff] %vm152_vm2, %v148_v42  ;;  %v194_v43 = vpop.f32.mrb[3].mxu0 }
 0x218   :  { %219 = shalt.err (!%p216_p4)
}
 0x219   :  { %s220_s6 = scalar_lea.hbm %s311_s4, 256 }
 0x21a   :  { %p221_p5 = scmp.ne.s32.totalorder %s311_s4, %s220_s6  ;;  %p224_p6 = scmp.lt.u32.totalorder %s220_s6, %s311_s4 }
 0x21c   :  { %p226_p7 = pnand %p224_p6, %p221_p5 }
 0x21e   :  { %229 = shalt.err (!%p226_p7)
}
 0x21f   :  { %s235_s11 = smov 128   ;;  %s236_s12 = smov 8  }
 0x220   :  { %166 = dma.vmem_to_hbm [thread:$0]  %s161_s30, 256, %s311_s4, [#allocation3], %s235_s11, %s235_s11, %s236_s12  }
 0x221   :  { %230 = dma.done.wait [#allocation3], 256  }
 0x222   :  { %231 = vsyncadd [#allocation3], 4294967040 }
 0x223   :  { %170 = vsyncpa [#allocation3], 1 }

</bundles_post_ra>
